<compile_context>
chip_gen: v7x
topology: tpu7x:2x2x1
jax: 0.10.0
libtpu: 0.0.40
codegen_flags: <defaults>
</compile_context>

<pallas_src>
import functools

import jax
import jax.numpy as jnp
import numpy as np
from jax.experimental import pallas as pl
from jax.experimental.pallas import tpu as pltpu

# ---------------- model hyper-parameters (small, consistent with __init__) ---
LOC_DIM = 6
CONTROL_DIM = 4
CNN_KERNEL = 5
EMB_DIM = 32
OUT_DIM = 6
NUM_LAYERS = 2
IN_FEAT = LOC_DIM * CNN_KERNEL + CONTROL_DIM * CNN_KERNEL * 2  # 70
KO = CNN_KERNEL * OUT_DIM                                       # 30

TC_MAX = 256        # max timesteps per grid step (big chunks amortize per-step overhead)
SLAB_W = 128        # packed output lanes: [logits(30) | danchor(30) | embs(32) | pad(36)]
UNROLL = 8          # partial unroll of the recurrence when the chunk is large


# ------------------------------ Pallas kernel --------------------------------
def _transformer_kernel(x_ref, anchor_ref,
                        wproj_ref, bproj_ref,
                        wih_ref, whh_ref, bias_ref,
                        wslab_ref, bslab_ref, tslab_ref,
                        h0_ref, c0_ref,
                        comb_ref, hn_ref, cn_ref,
                        seq_ref, gx_ref,
                        *, sT_real, needs_mask):
    # x_ref      : (Tc*B, Din)   flat, sublane/lane-dense DMA
    # anchor_ref : (Tc*B, O)
    # wproj      : (Din, H)      bproj : (1, H)
    # wih / whh  : (L, H, 4H)    bias  : (L, 1, 4H)   (= b_ih + b_hh, gate order i,f,g,o)
    # wslab      : (H, 128) = [W_head@M | W_head@M | I_H | 0]
    # bslab      : (1, 128) = [b_head@M | b_head@M | 0]
    # tslab      : (O, 128) = [tile(I_O) | 0]          (anchor broadcast, logits cols only)
    # h0 / c0    : (L, B, H)
    # comb_ref   : (Tc*B, 128)   packed output, single dense store per chunk
    # hn / cn    : (L, B, H)     VMEM-resident across the grid -> doubles as carried state
    # seq_ref    : (Tc, B, H)    scratch (layer input/output sequence, tile-aligned per-step)
    # gx_ref     : (Tc, B, 4H)   scratch (hoisted x @ W_ih gates)
    Tc, B, H = seq_ref.shape
    L = wih_ref.shape[0]
    G4 = 4 * H
    TB = Tc * B

    chunk = pl.program_id(0)
    t0 = chunk * Tc

    @pl.when(chunk == 0)
    def _init_state():
        hn_ref[...] = h0_ref[...]
        cn_ref[...] = c0_ref[...]

    # ---- trans_proj: Linear + SiLU, time-parallel on the flat (Tc*B, Din) block ----
    z = jnp.dot(x_ref[...], wproj_ref[...],
                preferred_element_type=jnp.float32) + bproj_ref[...]
    z = z * jax.nn.sigmoid(z)                     # SiLU
    cur = z                                       # flat (TB, H) input to layer 0

    # ---- stacked LSTM (eval semantics; x @ W_ih hoisted out of the recurrence) ----
    for layer in range(L):
        whh = whh_ref[layer]                                      # (H, 4H)
        gx = (jnp.dot(cur, wih_ref[layer], preferred_element_type=jnp.float32)
              + bias_ref[layer])                                   # (TB, 4H)
        gx_ref[...] = gx.reshape(Tc, B, G4)

        def step(t, carry, whh=whh):
            h, c = carry
            g = gx_ref[t] + jnp.dot(h, whh, preferred_element_type=jnp.float32)
            sg = jax.nn.sigmoid(g)                # 1 EUP push over all 4H lanes
            tg = jnp.tanh(g)                      # 1 EUP push over all 4H lanes
            i_g = sg[:, 0:H]
            f_g = sg[:, H:2 * H]
            o_g = sg[:, 3 * H:4 * H]
            g_g = tg[:, 2 * H:3 * H]
            c_new = f_g * c + i_g * g_g
            h_new = o_g * jnp.tanh(c_new)
            if needs_mask:
                valid = (t0 + t) < sT_real        # freeze state on padded timesteps
                h_new = jnp.where(valid, h_new, h)
                c_new = jnp.where(valid, c_new, c)
            seq_ref[t] = h_new
            return h_new, c_new

        unroll = True if Tc <= 2 * UNROLL else UNROLL
        h_fin, c_fin = jax.lax.fori_loop(
            0, Tc, step, (hn_ref[layer], cn_ref[layer]), unroll=unroll)
        hn_ref[layer] = h_fin
        cn_ref[layer] = c_fin
        cur = seq_ref[...].reshape(TB, H)         # flat input to next layer / head

    # ---- fused head: cumsum folded into W_slab, anchor via tiny matmul, packed store ----
    slab = (jnp.dot(cur, wslab_ref[...], preferred_element_type=jnp.float32)
            + bslab_ref[...]
            + jnp.dot(anchor_ref[...], tslab_ref[...],
                      preferred_element_type=jnp.float32))          # (TB, 128)
    comb_ref[...] = slab


# ------------------------------ kernel launcher --------------------------------
def _cumsum_mats():
    K, O = CNN_KERNEL, OUT_DIM
    M = np.zeros((K * O, K * O), np.float32)   # block lower-triangular (cumsum over k)
    T = np.zeros((O, K * O), np.float32)       # horizontal tiling of I_O (anchor broadcast)
    eye = np.eye(O, dtype=np.float32)
    for k2 in range(K):
        T[:, k2 * O:(k2 + 1) * O] = eye
        for k1 in range(k2 + 1):
            M[k1 * O:(k1 + 1) * O, k2 * O:(k2 + 1) * O] = eye
    return jnp.asarray(M), jnp.asarray(T)


def _full_spec(arr):
    nd = arr.ndim
    return pl.BlockSpec(tuple(arr.shape), lambda i, nd=nd: (0,) * nd)


def _run_kernel(x_tm, anchor_tm, params, h0, c0, tc_max=TC_MAX):
    sT, B, Din = x_tm.shape
    H, L = EMB_DIM, NUM_LAYERS
    O = anchor_tm.shape[2]

    n_chunks = pl.cdiv(sT, tc_max)
    Tc = pl.cdiv(sT, n_chunks)
    if n_chunks > 1:
        Tc = pl.cdiv(Tc, 8) * 8                 # keep block rows (Tc*B) sublane-dense
    sT_pad = n_chunks * Tc
    if sT_pad != sT:
        padn = sT_pad - sT
        x_tm = jnp.pad(x_tm, ((0, padn), (0, 0), (0, 0)))
        anchor_tm = jnp.pad(anchor_tm, ((0, padn), (0, 0), (0, 0)))

    # Flatten (T, B) -> dense (sT*B, feat) rows for DMA / output stores.
    x_flat = x_tm.reshape(sT_pad * B, Din)
    anchor_flat = anchor_tm.reshape(sT_pad * B, O)

    # Fold the cnn_kernel cumsum into the head weights and pack the full output slab.
    M, Tmat = _cumsum_mats()
    hp = jax.lax.Precision.HIGHEST
    w_cs = jnp.dot(params['w_head'], M, precision=hp)             # (H, KO)
    b_cs = jnp.dot(params['b_head'], M, precision=hp)             # (1, KO)
    w_slab = jnp.concatenate(
        [w_cs, w_cs, jnp.eye(H, dtype=jnp.float32),
         jnp.zeros((H, SLAB_W - 2 * KO - H), jnp.float32)], axis=1)     # (H, 128)
    b_slab = jnp.concatenate(
        [b_cs, b_cs, jnp.zeros((1, SLAB_W - 2 * KO), jnp.float32)], axis=1)   # (1, 128)
    t_slab = jnp.concatenate(
        [Tmat, jnp.zeros((O, SLAB_W - KO), jnp.float32)], axis=1)       # (O, 128)
    bias = params['b_ih'] + params['b_hh']                               # (L, 1, 4H)

    args = (x_flat, anchor_flat,
            params['w_proj'], params['b_proj'],
            params['w_ih'], params['w_hh'], bias,
            w_slab, b_slab, t_slab, h0, c0)

    in_specs = [
        pl.BlockSpec((Tc * B, Din), lambda i: (i, 0)),
        pl.BlockSpec((Tc * B, O), lambda i: (i, 0)),
    ] + [_full_spec(a) for a in args[2:]]

    out_shape = (
        jax.ShapeDtypeStruct((sT_pad * B, SLAB_W), jnp.float32),  # packed logits|danchor|embs
        jax.ShapeDtypeStruct((L, B, H), jnp.float32),             # h_n (also carried state)
        jax.ShapeDtypeStruct((L, B, H), jnp.float32),             # c_n (also carried state)
    )
    out_specs = (
        pl.BlockSpec((Tc * B, SLAB_W), lambda i: (i, 0)),
        pl.BlockSpec((L, B, H), lambda i: (0, 0, 0)),
        pl.BlockSpec((L, B, H), lambda i: (0, 0, 0)),
    )
    scratch_shapes = [
        pltpu.VMEM((Tc, B, H), jnp.float32),        # layer input/output sequence
        pltpu.VMEM((Tc, B, 4 * H), jnp.float32),    # hoisted x @ W_ih gates
    ]

    flops = 2 * sT_pad * B * (Din * H + 2 * L * H * 4 * H + H * SLAB_W + O * SLAB_W)
    transcend = sT_pad * B * (H + L * (2 * 4 * H + H))
    bytes_acc = (sum(int(np.prod(a.shape)) * 4 for a in args)
                 + sum(int(np.prod(s.shape)) * 4 for s in out_shape))

    kernel = functools.partial(_transformer_kernel,
                               sT_real=sT, needs_mask=(sT_pad != sT))

    comb, hn, cn = pl.pallas_call(
        kernel,
        out_shape=out_shape,
        grid_spec=pltpu.PrefetchScalarGridSpec(
            num_scalar_prefetch=0,
            grid=(n_chunks,),
            in_specs=in_specs,
            out_specs=out_specs,
            scratch_shapes=scratch_shapes),
        compiler_params=pltpu.CompilerParams(
            dimension_semantics=("arbitrary",),
            vmem_limit_bytes=32 * 1024 * 1024),
        cost_estimate=pl.CostEstimate(
            flops=int(flops), transcendentals=int(transcend),
            bytes_accessed=int(bytes_acc)),
    )(*args)

    comb = comb.reshape(sT_pad, B, SLAB_W)
    logits_tm = comb[:sT, :, 0:KO]
    danchor_tm = comb[:sT, :, KO:2 * KO]
    embs_tm = comb[:sT, :, 2 * KO:2 * KO + H]
    return logits_tm, danchor_tm, embs_tm, hn, cn


# ------------------------------ glue (plain JAX) ------------------------------
def _prepare(loc, control_feats, attention_mask):
    """Masking / padding / chunking exactly as in the PyTorch forward."""
    K = CNN_KERNEL
    loc = loc * attention_mask[:, :, None]
    control_feats = control_feats * attention_mask[:, :, None]
    B, T, F = loc.shape
    control_right_pad = 0
    if control_feats.shape[1] < T + K:
        control_right_pad = T + K - control_feats.shape[1]
    pad_left = 0
    if T % K != 0:
        pad_left = K - T % K
        loc = jnp.pad(loc, ((0, 0), (pad_left, 0), (0, 0)))
        attention_mask = jnp.pad(attention_mask, ((0, 0), (pad_left, 0)))
    control = jnp.pad(control_feats, ((0, 0), (pad_left, control_right_pad), (0, 0)))
    control = control.reshape(B, -1, CONTROL_DIM * K)
    dloc = jnp.pad(loc[:, 1:] - loc[:, :-1], ((0, 0), (1, 0), (0, 0)))
    anchor_loc = loc.reshape(B, -1, K, F)[:, :, -1:, :]  # (B, sT, 1, F)
    # TODO(synk): training-time Bernoulli mask() and LSTM inter-layer dropout are
    # stochastic training-only ops; eval-mode (identity) semantics implemented.
    dloc = dloc.reshape(B, -1, K * F)
    embs_in = jnp.concatenate([dloc, control[:, :-1], control[:, 1:]], axis=-1)  # (B, sT, Din)
    x_tm = jnp.transpose(embs_in, (1, 0, 2)).astype(jnp.float32)                 # (sT, B, Din)
    anchor_tm = jnp.transpose(anchor_loc[:, :, 0, :], (1, 0, 2)).astype(jnp.float32)  # (sT, B, F)
    return x_tm, anchor_tm, anchor_loc, pad_left


def transformer_forward(params, loc, control_feats, attention_mask, h=None, tc_max=TC_MAX):
    B, T, _ = loc.shape
    x_tm, anchor_tm, anchor_loc, pad_left = _prepare(loc, control_feats, attention_mask)
    sT = x_tm.shape[0]
    if h is None:
        h0 = jnp.zeros((NUM_LAYERS, B, EMB_DIM), jnp.float32)
        c0 = jnp.zeros((NUM_LAYERS, B, EMB_DIM), jnp.float32)
    else:
        h0, c0 = h

    logits_tm, danchor_tm, embs_tm, hn, cn = _run_kernel(
        x_tm, anchor_tm, params, h0, c0, tc_max=tc_max)

    logits_full = jnp.transpose(logits_tm, (1, 0, 2)).reshape(B, sT * CNN_KERNEL, OUT_DIM)
    logits = logits_full[:, pad_left:, :]
    logits_danchor = jnp.transpose(danchor_tm, (1, 0, 2)).reshape(B, sT, CNN_KERNEL, OUT_DIM)
    embs = jnp.transpose(embs_tm, (1, 0, 2))
    return {
        'logits.pth': logits,
        'embs.pth': embs,
        'h.pth': (hn, cn),
        'anchor_loc.pth': anchor_loc,
        'logits_danchor.pth': logits_danchor,
        'pad_left.id': pad_left,
    }


# ------------------------------ pure-JAX reference ----------------------------
def _reference_core(x_tm, anchor_tm, params, h0, c0):
    P = jax.lax.Precision.HIGHEST
    sT, B, _ = x_tm.shape
    H = EMB_DIM
    z = jnp.dot(x_tm.reshape(sT * B, -1), params['w_proj'], precision=P) + params['b_proj']
    z = z * jax.nn.sigmoid(z)
    seq = z.reshape(sT, B, H)
    hs, cs = [], []
    for layer in range(NUM_LAYERS):
        w_ih = params['w_ih'][layer]
        w_hh = params['w_hh'][layer]
        bias = params['b_ih'][layer] + params['b_hh'][layer]

        def step(carry, x_t, w_ih=w_ih, w_hh=w_hh, bias=bias):
            h, c = carry
            gates = (jnp.dot(x_t, w_ih, precision=P)
                     + jnp.dot(h, w_hh, precision=P) + bias)
            i_g = jax.nn.sigmoid(gates[:, :H])
            f_g = jax.nn.sigmoid(gates[:, H:2 * H])
            g_g = jnp.tanh(gates[:, 2 * H:3 * H])
            o_g = jax.nn.sigmoid(gates[:, 3 * H:])
            c = f_g * c + i_g * g_g
            h = o_g * jnp.tanh(c)
            return (h, c), h

        (h_f, c_f), seq = jax.lax.scan(step, (h0[layer], c0[layer]), seq)
        hs.append(h_f)
        cs.append(c_f)
    head = jnp.dot(seq.reshape(sT * B, H), params['w_head'], precision=P) + params['b_head']
    head = head.reshape(sT, B, CNN_KERNEL, OUT_DIM)
    danchor = jnp.cumsum(head, axis=2)
    logits = danchor + anchor_tm[:, :, None, :]
    return (logits.reshape(sT, B, -1), danchor.reshape(sT, B, -1),
            seq, jnp.stack(hs), jnp.stack(cs))


# ------------------------------ parameter init --------------------------------
def init_params(key):
    keys = jax.random.split(key, 8)
    bp = 1.0 / np.sqrt(IN_FEAT)
    bh = 1.0 / np.sqrt(EMB_DIM)
    u = lambda k, shape, b: jax.random.uniform(k, shape, jnp.float32, -b, b)
    return {
        'w_proj': u(keys[0], (IN_FEAT, EMB_DIM), bp),
        'b_proj': u(keys[1], (1, EMB_DIM), bp),
        'w_ih': u(keys[2], (NUM_LAYERS, EMB_DIM, 4 * EMB_DIM), bh),
        'w_hh': u(keys[3], (NUM_LAYERS, EMB_DIM, 4 * EMB_DIM), bh),
        'b_ih': u(keys[4], (NUM_LAYERS, 1, 4 * EMB_DIM), bh),
        'b_hh': u(keys[5], (NUM_LAYERS, 1, 4 * EMB_DIM), bh),
        'w_head': u(keys[6], (EMB_DIM, OUT_DIM * CNN_KERNEL), bh),
        'b_head': u(keys[7], (1, OUT_DIM * CNN_KERNEL), bh),
    }


# ----------------------------------- main --------------------------------------
if __name__ == "__main__":
    key = jax.random.PRNGKey(0)
    kp, k1, k2, k3, k4, k5, k6 = jax.random.split(key, 7)
    params = init_params(kp)

    def _check(B, T, kloc, kctl, tc_max=TC_MAX, tol=5e-3):
        loc = jax.random.normal(kloc, (B, T, LOC_DIM), jnp.float32)
        control = jax.random.normal(kctl, (B, T, CONTROL_DIM), jnp.float32)
        attn = jnp.ones((B, T), jnp.float32).at[:, -2:].set(0.0)

        out = transformer_forward(params, loc, control, attn, tc_max=tc_max)
        jax.block_until_ready(out['logits.pth'])
        assert out['logits.pth'].shape == (B, T, OUT_DIM)
        assert out['embs.pth'].shape[0] == B and out['embs.pth'].shape[2] == EMB_DIM
        assert out['h.pth'][0].shape == (NUM_LAYERS, B, EMB_DIM)

        # correctness check against a pure-JAX reference of the same math
        x_tm, anchor_tm, _, _ = _prepare(loc, control, attn)
        h0 = jnp.zeros((NUM_LAYERS, B, EMB_DIM), jnp.float32)
        c0 = jnp.zeros((NUM_LAYERS, B, EMB_DIM), jnp.float32)
        ker_outs = _run_kernel(x_tm, anchor_tm, params, h0, c0, tc_max=tc_max)
        ref_outs = _reference_core(x_tm, anchor_tm, params, h0, c0)
        jax.block_until_ready(ker_outs)
        for a, b in zip(ker_outs, ref_outs):
            np.testing.assert_allclose(np.asarray(a), np.asarray(b), rtol=tol, atol=tol)

    # T % cnn_kernel != 0 -> pad_left = 3; single small time chunk (fully unrolled loop)
    _check(2, 12, k1, k2)
    # small tc_max forces the multi-chunk grid, carried h/c state and masked (frozen)
    # padded timesteps in the last chunk
    _check(2, 83, k3, k4, tc_max=8)
    # long sequence at the default chunk size: multi-chunk grid with the partially
    # unrolled (unroll=8) recurrence; looser tolerance for accumulated matmul-pass
    # rounding differences over hundreds of recurrent steps
    _check(2, 1287, k5, k6, tol=2e-2)

    print("KERNEL_OK")
</pallas_src>

<mosaic_0001>
module attributes {stable_mosaic.version = 11 : i64} {
  func.func @_transformer_kernel(%arg0: i32, %arg1: memref<6x70xf32, #tpu.memory_space<vmem>>, %arg2: memref<6x6xf32, #tpu.memory_space<vmem>>, %arg3: memref<70x32xf32, #tpu.memory_space<vmem>>, %arg4: memref<1x32xf32, #tpu.memory_space<vmem>>, %arg5: memref<2x32x128xf32, #tpu.memory_space<vmem>>, %arg6: memref<2x32x128xf32, #tpu.memory_space<vmem>>, %arg7: memref<2x1x128xf32, #tpu.memory_space<vmem>>, %arg8: memref<32x128xf32, #tpu.memory_space<vmem>>, %arg9: memref<1x128xf32, #tpu.memory_space<vmem>>, %arg10: memref<6x128xf32, #tpu.memory_space<vmem>>, %arg11: memref<2x2x32xf32, #tpu.memory_space<vmem>>, %arg12: memref<2x2x32xf32, #tpu.memory_space<vmem>>, %arg13: memref<6x128xf32, #tpu.memory_space<vmem>>, %arg14: memref<2x2x32xf32, #tpu.memory_space<vmem>>, %arg15: memref<2x2x32xf32, #tpu.memory_space<vmem>>, %arg16: memref<3x2x32xf32, #tpu.memory_space<vmem>>, %arg17: memref<3x2x128xf32, #tpu.memory_space<vmem>>) attributes {dimension_semantics = [#tpu.dimension_semantics<arbitrary>], iteration_bounds = array<i64: 1>, scalar_prefetch = 0 : i64, scratch_operands = 2 : i64, tpu.core_type = #tpu.core_type<tc>, window_params = [{transform_indices = @transform_0, window_bounds = array<i64: 6, 70>}, {transform_indices = @transform_1, window_bounds = array<i64: 6, 6>}, {pipeline_mode = #tpu.pipeline_mode<synchronous>, transform_indices = @transform_2, window_bounds = array<i64: 70, 32>}, {pipeline_mode = #tpu.pipeline_mode<synchronous>, transform_indices = @transform_3, window_bounds = array<i64: 1, 32>}, {pipeline_mode = #tpu.pipeline_mode<synchronous>, transform_indices = @transform_4, window_bounds = array<i64: 2, 32, 128>}, {pipeline_mode = #tpu.pipeline_mode<synchronous>, transform_indices = @transform_5, window_bounds = array<i64: 2, 32, 128>}, {pipeline_mode = #tpu.pipeline_mode<synchronous>, transform_indices = @transform_6, window_bounds = array<i64: 2, 1, 128>}, {pipeline_mode = #tpu.pipeline_mode<synchronous>, transform_indices = @transform_7, window_bounds = array<i64: 32, 128>}, {pipeline_mode = #tpu.pipeline_mode<synchronous>, transform_indices = @transform_8, window_bounds = array<i64: 1, 128>}, {pipeline_mode = #tpu.pipeline_mode<synchronous>, transform_indices = @transform_9, window_bounds = array<i64: 6, 128>}, {pipeline_mode = #tpu.pipeline_mode<synchronous>, transform_indices = @transform_10, window_bounds = array<i64: 2, 2, 32>}, {pipeline_mode = #tpu.pipeline_mode<synchronous>, transform_indices = @transform_11, window_bounds = array<i64: 2, 2, 32>}, {transform_indices = @transform_12, window_bounds = array<i64: 6, 128>}, {pipeline_mode = #tpu.pipeline_mode<synchronous>, transform_indices = @transform_13, window_bounds = array<i64: 2, 2, 32>}, {pipeline_mode = #tpu.pipeline_mode<synchronous>, transform_indices = @transform_14, window_bounds = array<i64: 2, 2, 32>}]} {
    %c0_i32 = arith.constant 0 : i32
    %0 = arith.cmpi eq, %arg0, %c0_i32 : i32
    %1 = arith.extui %0 : i1 to i32
    %c0_i32_0 = arith.constant 0 : i32
    %2 = arith.cmpi ne, %1, %c0_i32_0 : i32
    scf.if %2 {
      %c0_115 = arith.constant 0 : index
      %c0_116 = arith.constant 0 : index
      %c0_117 = arith.constant 0 : index
      %215 = vector.load %arg11[%c0_115, %c0_116, %c0_117] : memref<2x2x32xf32, #tpu.memory_space<vmem>>, vector<2x2x32xf32>
      %c0_118 = arith.constant 0 : index
      %c0_119 = arith.constant 0 : index
      %c0_120 = arith.constant 0 : index
      %216 = vector.load %arg14[%c0_118, %c0_119, %c0_120] : memref<2x2x32xf32, #tpu.memory_space<vmem>>, vector<2x2x32xf32>
      tpu.vector_store %arg14[%c0_118, %c0_119, %c0_120], %215 {strides = array<i32>} : memref<2x2x32xf32, #tpu.memory_space<vmem>>, vector<2x2x32xf32>,
      %c0_121 = arith.constant 0 : index
      %c0_122 = arith.constant 0 : index
      %c0_123 = arith.constant 0 : index
      %217 = vector.load %arg12[%c0_121, %c0_122, %c0_123] : memref<2x2x32xf32, #tpu.memory_space<vmem>>, vector<2x2x32xf32>
      %c0_124 = arith.constant 0 : index
      %c0_125 = arith.constant 0 : index
      %c0_126 = arith.constant 0 : index
      %218 = vector.load %arg15[%c0_124, %c0_125, %c0_126] : memref<2x2x32xf32, #tpu.memory_space<vmem>>, vector<2x2x32xf32>
      tpu.vector_store %arg15[%c0_124, %c0_125, %c0_126], %217 {strides = array<i32>} : memref<2x2x32xf32, #tpu.memory_space<vmem>>, vector<2x2x32xf32>,
    } else {
    }
    %c0 = arith.constant 0 : index
    %c0_1 = arith.constant 0 : index
    %3 = vector.load %arg1[%c0, %c0_1] : memref<6x70xf32, #tpu.memory_space<vmem>>, vector<6x70xf32>
    %c0_2 = arith.constant 0 : index
    %c0_3 = arith.constant 0 : index
    %4 = vector.load %arg3[%c0_2, %c0_3] : memref<70x32xf32, #tpu.memory_space<vmem>>, vector<70x32xf32>
    %cst = arith.constant dense<0.000000e+00> : vector<6x32xf32>
    %5 = tpu.matmul %3, %4, %cst {dimension_numbers = #tpu.dot_dimension_numbers<[1], [0], [0], [1], [0, 0, 1, 1], [], []>} : vector<6x70xf32>, vector<70x32xf32>, vector<6x32xf32> -> vector<6x32xf32>
    %c0_4 = arith.constant 0 : index
    %c0_5 = arith.constant 0 : index
    %6 = vector.load %arg4[%c0_4, %c0_5] : memref<1x32xf32, #tpu.memory_space<vmem>>, vector<1x32xf32>
    %7 = vector.broadcast %6 : vector<1x32xf32> to vector<6x32xf32>
    %8 = arith.addf %5, %7 : vector<6x32xf32>
    %9 = arith.negf %8 : vector<6x32xf32>
    %10 = math.exp %9 : vector<6x32xf32>
    %cst_6 = arith.constant 1.000000e+00 : f32
    %11 = vector.broadcast %cst_6 : f32 to vector<6x32xf32>
    %12 = arith.addf %11, %10 : vector<6x32xf32>
    %13 = arith.divf %11, %12 : vector<6x32xf32>
    %14 = arith.mulf %8, %13 : vector<6x32xf32>
    %c0_7 = arith.constant 0 : index
    %c0_8 = arith.constant 0 : index
    %c0_9 = arith.constant 0 : index
    %15 = vector.load %arg6[%c0_7, %c0_8, %c0_9] : memref<2x32x128xf32, #tpu.memory_space<vmem>>, vector<1x32x128xf32>
    %16 = vector.shape_cast %15 : vector<1x32x128xf32> to vector<32x128xf32>
    %c0_10 = arith.constant 0 : index
    %c0_11 = arith.constant 0 : index
    %c0_12 = arith.constant 0 : index
    %17 = vector.load %arg5[%c0_10, %c0_11, %c0_12] : memref<2x32x128xf32, #tpu.memory_space<vmem>>, vector<1x32x128xf32>
    %18 = vector.shape_cast %17 : vector<1x32x128xf32> to vector<32x128xf32>
    %cst_13 = arith.constant dense<0.000000e+00> : vector<6x128xf32>
    %19 = tpu.matmul %14, %18, %cst_13 {dimension_numbers = #tpu.dot_dimension_numbers<[1], [0], [0], [1], [0, 0, 1, 1], [], []>} : vector<6x32xf32>, vector<32x128xf32>, vector<6x128xf32> -> vector<6x128xf32>
    %c0_14 = arith.constant 0 : index
    %c0_15 = arith.constant 0 : index
    %c0_16 = arith.constant 0 : index
    %20 = vector.load %arg7[%c0_14, %c0_15, %c0_16] : memref<2x1x128xf32, #tpu.memory_space<vmem>>, vector<1x1x128xf32>
    %21 = vector.shape_cast %20 : vector<1x1x128xf32> to vector<1x128xf32>
    %22 = vector.broadcast %21 : vector<1x128xf32> to vector<6x128xf32>
    %23 = arith.addf %19, %22 : vector<6x128xf32>
    %24 = vector.shape_cast %23 : vector<6x128xf32> to vector<3x2x128xf32>
    %c0_17 = arith.constant 0 : index
    %c0_18 = arith.constant 0 : index
    %c0_19 = arith.constant 0 : index
    %25 = vector.load %arg17[%c0_17, %c0_18, %c0_19] : memref<3x2x128xf32, #tpu.memory_space<vmem>>, vector<3x2x128xf32>
    tpu.vector_store %arg17[%c0_17, %c0_18, %c0_19], %24 {strides = array<i32>} : memref<3x2x128xf32, #tpu.memory_space<vmem>>, vector<3x2x128xf32>,
    %c0_20 = arith.constant 0 : index
    %c0_21 = arith.constant 0 : index
    %c0_22 = arith.constant 0 : index
    %26 = vector.load %arg14[%c0_20, %c0_21, %c0_22] : memref<2x2x32xf32, #tpu.memory_space<vmem>>, vector<1x2x32xf32>
    %27 = vector.shape_cast %26 : vector<1x2x32xf32> to vector<2x32xf32>
    %c0_23 = arith.constant 0 : index
    %c0_24 = arith.constant 0 : index
    %c0_25 = arith.constant 0 : index
    %28 = vector.load %arg15[%c0_23, %c0_24, %c0_25] : memref<2x2x32xf32, #tpu.memory_space<vmem>>, vector<1x2x32xf32>
    %29 = vector.shape_cast %28 : vector<1x2x32xf32> to vector<2x32xf32>
    %c0_i32_26 = arith.constant 0 : i32
    %30 = arith.index_cast %c0_i32_26 : i32 to index
    %c0_27 = arith.constant 0 : index
    %c0_28 = arith.constant 0 : index
    %31 = vector.load %arg17[%30, %c0_27, %c0_28] : memref<3x2x128xf32, #tpu.memory_space<vmem>>, vector<1x2x128xf32>
    %32 = vector.shape_cast %31 : vector<1x2x128xf32> to vector<2x128xf32>
    %cst_29 = arith.constant dense<0.000000e+00> : vector<2x128xf32>
    %33 = tpu.matmul %27, %16, %cst_29 {dimension_numbers = #tpu.dot_dimension_numbers<[1], [0], [0], [1], [0, 0, 1, 1], [], []>} : vector<2x32xf32>, vector<32x128xf32>, vector<2x128xf32> -> vector<2x128xf32>
    %34 = arith.addf %32, %33 : vector<2x128xf32>
    %35 = arith.negf %34 : vector<2x128xf32>
    %36 = math.exp %35 : vector<2x128xf32>
    %cst_30 = arith.constant 1.000000e+00 : f32
    %37 = vector.broadcast %cst_30 : f32 to vector<2x128xf32>
    %38 = arith.addf %37, %36 : vector<2x128xf32>
    %39 = arith.divf %37, %38 : vector<2x128xf32>
    %40 = math.tanh %34 : vector<2x128xf32>
    %41 = vector.extract_strided_slice %39 {offsets = [0, 0], sizes = [2, 32], strides = [1, 1]} : vector<2x128xf32> to vector<2x32xf32>
    %42 = vector.extract_strided_slice %39 {offsets = [0, 32], sizes = [2, 32], strides = [1, 1]} : vector<2x128xf32> to vector<2x32xf32>
    %43 = vector.extract_strided_slice %39 {offsets = [0, 96], sizes = [2, 32], strides = [1, 1]} : vector<2x128xf32> to vector<2x32xf32>
    %44 = vector.extract_strided_slice %40 {offsets = [0, 64], sizes = [2, 32], strides = [1, 1]} : vector<2x128xf32> to vector<2x32xf32>
    %45 = arith.mulf %42, %29 : vector<2x32xf32>
    %46 = arith.mulf %41, %44 : vector<2x32xf32>
    %47 = arith.addf %45, %46 : vector<2x32xf32>
    %48 = math.tanh %47 : vector<2x32xf32>
    %49 = arith.mulf %43, %48 : vector<2x32xf32>
    %50 = arith.index_cast %c0_i32_26 : i32 to index
    %c0_31 = arith.constant 0 : index
    %c0_32 = arith.constant 0 : index
    %51 = vector.load %arg16[%50, %c0_31, %c0_32] : memref<3x2x32xf32, #tpu.memory_space<vmem>>, vector<1x2x32xf32>
    %52 = vector.shape_cast %51 : vector<1x2x32xf32> to vector<2x32xf32>
    %53 = vector.shape_cast %49 : vector<2x32xf32> to vector<1x2x32xf32>
    tpu.vector_store %arg16[%50, %c0_31, %c0_32], %53 {strides = array<i32>} : memref<3x2x32xf32, #tpu.memory_space<vmem>>, vector<1x2x32xf32>,
    %c1_i32 = arith.constant 1 : i32
    %54 = arith.index_cast %c1_i32 : i32 to index
    %c0_33 = arith.constant 0 : index
    %c0_34 = arith.constant 0 : index
    %55 = vector.load %arg17[%54, %c0_33, %c0_34] : memref<3x2x128xf32, #tpu.memory_space<vmem>>, vector<1x2x128xf32>
    %56 = vector.shape_cast %55 : vector<1x2x128xf32> to vector<2x128xf32>
    %cst_35 = arith.constant dense<0.000000e+00> : vector<2x128xf32>
    %57 = tpu.matmul %49, %16, %cst_35 {dimension_numbers = #tpu.dot_dimension_numbers<[1], [0], [0], [1], [0, 0, 1, 1], [], []>} : vector<2x32xf32>, vector<32x128xf32>, vector<2x128xf32> -> vector<2x128xf32>
    %58 = arith.addf %56, %57 : vector<2x128xf32>
    %59 = arith.negf %58 : vector<2x128xf32>
    %60 = math.exp %59 : vector<2x128xf32>
    %cst_36 = arith.constant 1.000000e+00 : f32
    %61 = vector.broadcast %cst_36 : f32 to vector<2x128xf32>
    %62 = arith.addf %61, %60 : vector<2x128xf32>
    %63 = arith.divf %61, %62 : vector<2x128xf32>
    %64 = math.tanh %58 : vector<2x128xf32>
    %65 = vector.extract_strided_slice %63 {offsets = [0, 0], sizes = [2, 32], strides = [1, 1]} : vector<2x128xf32> to vector<2x32xf32>
    %66 = vector.extract_strided_slice %63 {offsets = [0, 32], sizes = [2, 32], strides = [1, 1]} : vector<2x128xf32> to vector<2x32xf32>
    %67 = vector.extract_strided_slice %63 {offsets = [0, 96], sizes = [2, 32], strides = [1, 1]} : vector<2x128xf32> to vector<2x32xf32>
    %68 = vector.extract_strided_slice %64 {offsets = [0, 64], sizes = [2, 32], strides = [1, 1]} : vector<2x128xf32> to vector<2x32xf32>
    %69 = arith.mulf %66, %47 : vector<2x32xf32>
    %70 = arith.mulf %65, %68 : vector<2x32xf32>
    %71 = arith.addf %69, %70 : vector<2x32xf32>
    %72 = math.tanh %71 : vector<2x32xf32>
    %73 = arith.mulf %67, %72 : vector<2x32xf32>
    %74 = arith.index_cast %c1_i32 : i32 to index
    %c0_37 = arith.constant 0 : index
    %c0_38 = arith.constant 0 : index
    %75 = vector.load %arg16[%74, %c0_37, %c0_38] : memref<3x2x32xf32, #tpu.memory_space<vmem>>, vector<1x2x32xf32>
    %76 = vector.shape_cast %75 : vector<1x2x32xf32> to vector<2x32xf32>
    %77 = vector.shape_cast %73 : vector<2x32xf32> to vector<1x2x32xf32>
    tpu.vector_store %arg16[%74, %c0_37, %c0_38], %77 {strides = array<i32>} : memref<3x2x32xf32, #tpu.memory_space<vmem>>, vector<1x2x32xf32>,
    %c2_i32 = arith.constant 2 : i32
    %78 = arith.index_cast %c2_i32 : i32 to index
    %c0_39 = arith.constant 0 : index
    %c0_40 = arith.constant 0 : index
    %79 = vector.load %arg17[%78, %c0_39, %c0_40] : memref<3x2x128xf32, #tpu.memory_space<vmem>>, vector<1x2x128xf32>
    %80 = vector.shape_cast %79 : vector<1x2x128xf32> to vector<2x128xf32>
    %cst_41 = arith.constant dense<0.000000e+00> : vector<2x128xf32>
    %81 = tpu.matmul %73, %16, %cst_41 {dimension_numbers = #tpu.dot_dimension_numbers<[1], [0], [0], [1], [0, 0, 1, 1], [], []>} : vector<2x32xf32>, vector<32x128xf32>, vector<2x128xf32> -> vector<2x128xf32>
    %82 = arith.addf %80, %81 : vector<2x128xf32>
    %83 = arith.negf %82 : vector<2x128xf32>
    %84 = math.exp %83 : vector<2x128xf32>
    %cst_42 = arith.constant 1.000000e+00 : f32
    %85 = vector.broadcast %cst_42 : f32 to vector<2x128xf32>
    %86 = arith.addf %85, %84 : vector<2x128xf32>
    %87 = arith.divf %85, %86 : vector<2x128xf32>
    %88 = math.tanh %82 : vector<2x128xf32>
    %89 = vector.extract_strided_slice %87 {offsets = [0, 0], sizes = [2, 32], strides = [1, 1]} : vector<2x128xf32> to vector<2x32xf32>
    %90 = vector.extract_strided_slice %87 {offsets = [0, 32], sizes = [2, 32], strides = [1, 1]} : vector<2x128xf32> to vector<2x32xf32>
    %91 = vector.extract_strided_slice %87 {offsets = [0, 96], sizes = [2, 32], strides = [1, 1]} : vector<2x128xf32> to vector<2x32xf32>
    %92 = vector.extract_strided_slice %88 {offsets = [0, 64], sizes = [2, 32], strides = [1, 1]} : vector<2x128xf32> to vector<2x32xf32>
    %93 = arith.mulf %90, %71 : vector<2x32xf32>
    %94 = arith.mulf %89, %92 : vector<2x32xf32>
    %95 = arith.addf %93, %94 : vector<2x32xf32>
    %96 = math.tanh %95 : vector<2x32xf32>
    %97 = arith.mulf %91, %96 : vector<2x32xf32>
    %98 = arith.index_cast %c2_i32 : i32 to index
    %c0_43 = arith.constant 0 : index
    %c0_44 = arith.constant 0 : index
    %99 = vector.load %arg16[%98, %c0_43, %c0_44] : memref<3x2x32xf32, #tpu.memory_space<vmem>>, vector<1x2x32xf32>
    %100 = vector.shape_cast %99 : vector<1x2x32xf32> to vector<2x32xf32>
    %101 = vector.shape_cast %97 : vector<2x32xf32> to vector<1x2x32xf32>
    tpu.vector_store %arg16[%98, %c0_43, %c0_44], %101 {strides = array<i32>} : memref<3x2x32xf32, #tpu.memory_space<vmem>>, vector<1x2x32xf32>,
    %c3_i32 = arith.constant 3 : i32
    %c0_45 = arith.constant 0 : index
    %c0_46 = arith.constant 0 : index
    %c0_47 = arith.constant 0 : index
    %102 = vector.load %arg14[%c0_45, %c0_46, %c0_47] : memref<2x2x32xf32, #tpu.memory_space<vmem>>, vector<1x2x32xf32>
    %103 = vector.shape_cast %102 : vector<1x2x32xf32> to vector<2x32xf32>
    %104 = vector.shape_cast %97 : vector<2x32xf32> to vector<1x2x32xf32>
    tpu.vector_store %arg14[%c0_45, %c0_46, %c0_47], %104 {strides = array<i32>} : memref<2x2x32xf32, #tpu.memory_space<vmem>>, vector<1x2x32xf32>,
    %c0_48 = arith.constant 0 : index
    %c0_49 = arith.constant 0 : index
    %c0_50 = arith.constant 0 : index
    %105 = vector.load %arg15[%c0_48, %c0_49, %c0_50] : memref<2x2x32xf32, #tpu.memory_space<vmem>>, vector<1x2x32xf32>
    %106 = vector.shape_cast %105 : vector<1x2x32xf32> to vector<2x32xf32>
    %107 = vector.shape_cast %95 : vector<2x32xf32> to vector<1x2x32xf32>
    tpu.vector_store %arg15[%c0_48, %c0_49, %c0_50], %107 {strides = array<i32>} : memref<2x2x32xf32, #tpu.memory_space<vmem>>, vector<1x2x32xf32>,
    %c0_51 = arith.constant 0 : index
    %c0_52 = arith.constant 0 : index
    %c0_53 = arith.constant 0 : index
    %108 = vector.load %arg16[%c0_51, %c0_52, %c0_53] : memref<3x2x32xf32, #tpu.memory_space<vmem>>, vector<3x2x32xf32>
    %109 = vector.shape_cast %108 : vector<3x2x32xf32> to vector<6x32xf32>
    %c1 = arith.constant 1 : index
    %c0_54 = arith.constant 0 : index
    %c0_55 = arith.constant 0 : index
    %110 = vector.load %arg6[%c1, %c0_54, %c0_55] : memref<2x32x128xf32, #tpu.memory_space<vmem>>, vector<1x32x128xf32>
    %111 = vector.shape_cast %110 : vector<1x32x128xf32> to vector<32x128xf32>
    %c1_56 = arith.constant 1 : index
    %c0_57 = arith.constant 0 : index
    %c0_58 = arith.constant 0 : index
    %112 = vector.load %arg5[%c1_56, %c0_57, %c0_58] : memref<2x32x128xf32, #tpu.memory_space<vmem>>, vector<1x32x128xf32>
    %113 = vector.shape_cast %112 : vector<1x32x128xf32> to vector<32x128xf32>
    %cst_59 = arith.constant dense<0.000000e+00> : vector<6x128xf32>
    %114 = tpu.matmul %109, %113, %cst_59 {dimension_numbers = #tpu.dot_dimension_numbers<[1], [0], [0], [1], [0, 0, 1, 1], [], []>} : vector<6x32xf32>, vector<32x128xf32>, vector<6x128xf32> -> vector<6x128xf32>
    %c1_60 = arith.constant 1 : index
    %c0_61 = arith.constant 0 : index
    %c0_62 = arith.constant 0 : index
    %115 = vector.load %arg7[%c1_60, %c0_61, %c0_62] : memref<2x1x128xf32, #tpu.memory_space<vmem>>, vector<1x1x128xf32>
    %116 = vector.shape_cast %115 : vector<1x1x128xf32> to vector<1x128xf32>
    %117 = vector.broadcast %116 : vector<1x128xf32> to vector<6x128xf32>
    %118 = arith.addf %114, %117 : vector<6x128xf32>
    %119 = vector.shape_cast %118 : vector<6x128xf32> to vector<3x2x128xf32>
    %c0_63 = arith.constant 0 : index
    %c0_64 = arith.constant 0 : index
    %c0_65 = arith.constant 0 : index
    %120 = vector.load %arg17[%c0_63, %c0_64, %c0_65] : memref<3x2x128xf32, #tpu.memory_space<vmem>>, vector<3x2x128xf32>
    tpu.vector_store %arg17[%c0_63, %c0_64, %c0_65], %119 {strides = array<i32>} : memref<3x2x128xf32, #tpu.memory_space<vmem>>, vector<3x2x128xf32>,
    %c1_66 = arith.constant 1 : index
    %c0_67 = arith.constant 0 : index
    %c0_68 = arith.constant 0 : index
    %121 = vector.load %arg14[%c1_66, %c0_67, %c0_68] : memref<2x2x32xf32, #tpu.memory_space<vmem>>, vector<1x2x32xf32>
    %122 = vector.shape_cast %121 : vector<1x2x32xf32> to vector<2x32xf32>
    %c1_69 = arith.constant 1 : index
    %c0_70 = arith.constant 0 : index
    %c0_71 = arith.constant 0 : index
    %123 = vector.load %arg15[%c1_69, %c0_70, %c0_71] : memref<2x2x32xf32, #tpu.memory_space<vmem>>, vector<1x2x32xf32>
    %124 = vector.shape_cast %123 : vector<1x2x32xf32> to vector<2x32xf32>
    %c0_i32_72 = arith.constant 0 : i32
    %125 = arith.index_cast %c0_i32_72 : i32 to index
    %c0_73 = arith.constant 0 : index
    %c0_74 = arith.constant 0 : index
    %126 = vector.load %arg17[%125, %c0_73, %c0_74] : memref<3x2x128xf32, #tpu.memory_space<vmem>>, vector<1x2x128xf32>
    %127 = vector.shape_cast %126 : vector<1x2x128xf32> to vector<2x128xf32>
    %cst_75 = arith.constant dense<0.000000e+00> : vector<2x128xf32>
    %128 = tpu.matmul %122, %111, %cst_75 {dimension_numbers = #tpu.dot_dimension_numbers<[1], [0], [0], [1], [0, 0, 1, 1], [], []>} : vector<2x32xf32>, vector<32x128xf32>, vector<2x128xf32> -> vector<2x128xf32>
    %129 = arith.addf %127, %128 : vector<2x128xf32>
    %130 = arith.negf %129 : vector<2x128xf32>
    %131 = math.exp %130 : vector<2x128xf32>
    %cst_76 = arith.constant 1.000000e+00 : f32
    %132 = vector.broadcast %cst_76 : f32 to vector<2x128xf32>
    %133 = arith.addf %132, %131 : vector<2x128xf32>
    %134 = arith.divf %132, %133 : vector<2x128xf32>
    %135 = math.tanh %129 : vector<2x128xf32>
    %136 = vector.extract_strided_slice %134 {offsets = [0, 0], sizes = [2, 32], strides = [1, 1]} : vector<2x128xf32> to vector<2x32xf32>
    %137 = vector.extract_strided_slice %134 {offsets = [0, 32], sizes = [2, 32], strides = [1, 1]} : vector<2x128xf32> to vector<2x32xf32>
    %138 = vector.extract_strided_slice %134 {offsets = [0, 96], sizes = [2, 32], strides = [1, 1]} : vector<2x128xf32> to vector<2x32xf32>
    %139 = vector.extract_strided_slice %135 {offsets = [0, 64], sizes = [2, 32], strides = [1, 1]} : vector<2x128xf32> to vector<2x32xf32>
    %140 = arith.mulf %137, %124 : vector<2x32xf32>
    %141 = arith.mulf %136, %139 : vector<2x32xf32>
    %142 = arith.addf %140, %141 : vector<2x32xf32>
    %143 = math.tanh %142 : vector<2x32xf32>
    %144 = arith.mulf %138, %143 : vector<2x32xf32>
    %145 = arith.index_cast %c0_i32_72 : i32 to index
    %c0_77 = arith.constant 0 : index
    %c0_78 = arith.constant 0 : index
    %146 = vector.load %arg16[%145, %c0_77, %c0_78] : memref<3x2x32xf32, #tpu.memory_space<vmem>>, vector<1x2x32xf32>
    %147 = vector.shape_cast %146 : vector<1x2x32xf32> to vector<2x32xf32>
    %148 = vector.shape_cast %144 : vector<2x32xf32> to vector<1x2x32xf32>
    tpu.vector_store %arg16[%145, %c0_77, %c0_78], %148 {strides = array<i32>} : memref<3x2x32xf32, #tpu.memory_space<vmem>>, vector<1x2x32xf32>,
    %c1_i32_79 = arith.constant 1 : i32
    %149 = arith.index_cast %c1_i32_79 : i32 to index
    %c0_80 = arith.constant 0 : index
    %c0_81 = arith.constant 0 : index
    %150 = vector.load %arg17[%149, %c0_80, %c0_81] : memref<3x2x128xf32, #tpu.memory_space<vmem>>, vector<1x2x128xf32>
    %151 = vector.shape_cast %150 : vector<1x2x128xf32> to vector<2x128xf32>
    %cst_82 = arith.constant dense<0.000000e+00> : vector<2x128xf32>
    %152 = tpu.matmul %144, %111, %cst_82 {dimension_numbers = #tpu.dot_dimension_numbers<[1], [0], [0], [1], [0, 0, 1, 1], [], []>} : vector<2x32xf32>, vector<32x128xf32>, vector<2x128xf32> -> vector<2x128xf32>
    %153 = arith.addf %151, %152 : vector<2x128xf32>
    %154 = arith.negf %153 : vector<2x128xf32>
    %155 = math.exp %154 : vector<2x128xf32>
    %cst_83 = arith.constant 1.000000e+00 : f32
    %156 = vector.broadcast %cst_83 : f32 to vector<2x128xf32>
    %157 = arith.addf %156, %155 : vector<2x128xf32>
    %158 = arith.divf %156, %157 : vector<2x128xf32>
    %159 = math.tanh %153 : vector<2x128xf32>
    %160 = vector.extract_strided_slice %158 {offsets = [0, 0], sizes = [2, 32], strides = [1, 1]} : vector<2x128xf32> to vector<2x32xf32>
    %161 = vector.extract_strided_slice %158 {offsets = [0, 32], sizes = [2, 32], strides = [1, 1]} : vector<2x128xf32> to vector<2x32xf32>
    %162 = vector.extract_strided_slice %158 {offsets = [0, 96], sizes = [2, 32], strides = [1, 1]} : vector<2x128xf32> to vector<2x32xf32>
    %163 = vector.extract_strided_slice %159 {offsets = [0, 64], sizes = [2, 32], strides = [1, 1]} : vector<2x128xf32> to vector<2x32xf32>
    %164 = arith.mulf %161, %142 : vector<2x32xf32>
    %165 = arith.mulf %160, %163 : vector<2x32xf32>
    %166 = arith.addf %164, %165 : vector<2x32xf32>
    %167 = math.tanh %166 : vector<2x32xf32>
    %168 = arith.mulf %162, %167 : vector<2x32xf32>
    %169 = arith.index_cast %c1_i32_79 : i32 to index
    %c0_84 = arith.constant 0 : index
    %c0_85 = arith.constant 0 : index
    %170 = vector.load %arg16[%169, %c0_84, %c0_85] : memref<3x2x32xf32, #tpu.memory_space<vmem>>, vector<1x2x32xf32>
    %171 = vector.shape_cast %170 : vector<1x2x32xf32> to vector<2x32xf32>
    %172 = vector.shape_cast %168 : vector<2x32xf32> to vector<1x2x32xf32>
    tpu.vector_store %arg16[%169, %c0_84, %c0_85], %172 {strides = array<i32>} : memref<3x2x32xf32, #tpu.memory_space<vmem>>, vector<1x2x32xf32>,
    %c2_i32_86 = arith.constant 2 : i32
    %173 = arith.index_cast %c2_i32_86 : i32 to index
    %c0_87 = arith.constant 0 : index
    %c0_88 = arith.constant 0 : index
    %174 = vector.load %arg17[%173, %c0_87, %c0_88] : memref<3x2x128xf32, #tpu.memory_space<vmem>>, vector<1x2x128xf32>
    %175 = vector.shape_cast %174 : vector<1x2x128xf32> to vector<2x128xf32>
    %cst_89 = arith.constant dense<0.000000e+00> : vector<2x128xf32>
    %176 = tpu.matmul %168, %111, %cst_89 {dimension_numbers = #tpu.dot_dimension_numbers<[1], [0], [0], [1], [0, 0, 1, 1], [], []>} : vector<2x32xf32>, vector<32x128xf32>, vector<2x128xf32> -> vector<2x128xf32>
    %177 = arith.addf %175, %176 : vector<2x128xf32>
    %178 = arith.negf %177 : vector<2x128xf32>
    %179 = math.exp %178 : vector<2x128xf32>
    %cst_90 = arith.constant 1.000000e+00 : f32
    %180 = vector.broadcast %cst_90 : f32 to vector<2x128xf32>
    %181 = arith.addf %180, %179 : vector<2x128xf32>
    %182 = arith.divf %180, %181 : vector<2x128xf32>
    %183 = math.tanh %177 : vector<2x128xf32>
    %184 = vector.extract_strided_slice %182 {offsets = [0, 0], sizes = [2, 32], strides = [1, 1]} : vector<2x128xf32> to vector<2x32xf32>
    %185 = vector.extract_strided_slice %182 {offsets = [0, 32], sizes = [2, 32], strides = [1, 1]} : vector<2x128xf32> to vector<2x32xf32>
    %186 = vector.extract_strided_slice %182 {offsets = [0, 96], sizes = [2, 32], strides = [1, 1]} : vector<2x128xf32> to vector<2x32xf32>
    %187 = vector.extract_strided_slice %183 {offsets = [0, 64], sizes = [2, 32], strides = [1, 1]} : vector<2x128xf32> to vector<2x32xf32>
    %188 = arith.mulf %185, %166 : vector<2x32xf32>
    %189 = arith.mulf %184, %187 : vector<2x32xf32>
    %190 = arith.addf %188, %189 : vector<2x32xf32>
    %191 = math.tanh %190 : vector<2x32xf32>
    %192 = arith.mulf %186, %191 : vector<2x32xf32>
    %193 = arith.index_cast %c2_i32_86 : i32 to index
    %c0_91 = arith.constant 0 : index
    %c0_92 = arith.constant 0 : index
    %194 = vector.load %arg16[%193, %c0_91, %c0_92] : memref<3x2x32xf32, #tpu.memory_space<vmem>>, vector<1x2x32xf32>
    %195 = vector.shape_cast %194 : vector<1x2x32xf32> to vector<2x32xf32>
    %196 = vector.shape_cast %192 : vector<2x32xf32> to vector<1x2x32xf32>
    tpu.vector_store %arg16[%193, %c0_91, %c0_92], %196 {strides = array<i32>} : memref<3x2x32xf32, #tpu.memory_space<vmem>>, vector<1x2x32xf32>,
    %c3_i32_93 = arith.constant 3 : i32
    %c1_94 = arith.constant 1 : index
    %c0_95 = arith.constant 0 : index
    %c0_96 = arith.constant 0 : index
    %197 = vector.load %arg14[%c1_94, %c0_95, %c0_96] : memref<2x2x32xf32, #tpu.memory_space<vmem>>, vector<1x2x32xf32>
    %198 = vector.shape_cast %197 : vector<1x2x32xf32> to vector<2x32xf32>
    %199 = vector.shape_cast %192 : vector<2x32xf32> to vector<1x2x32xf32>
    tpu.vector_store %arg14[%c1_94, %c0_95, %c0_96], %199 {strides = array<i32>} : memref<2x2x32xf32, #tpu.memory_space<vmem>>, vector<1x2x32xf32>,
    %c1_97 = arith.constant 1 : index
    %c0_98 = arith.constant 0 : index
    %c0_99 = arith.constant 0 : index
    %200 = vector.load %arg15[%c1_97, %c0_98, %c0_99] : memref<2x2x32xf32, #tpu.memory_space<vmem>>, vector<1x2x32xf32>
    %201 = vector.shape_cast %200 : vector<1x2x32xf32> to vector<2x32xf32>
    %202 = vector.shape_cast %190 : vector<2x32xf32> to vector<1x2x32xf32>
    tpu.vector_store %arg15[%c1_97, %c0_98, %c0_99], %202 {strides = array<i32>} : memref<2x2x32xf32, #tpu.memory_space<vmem>>, vector<1x2x32xf32>,
    %c0_100 = arith.constant 0 : index
    %c0_101 = arith.constant 0 : index
    %c0_102 = arith.constant 0 : index
    %203 = vector.load %arg16[%c0_100, %c0_101, %c0_102] : memref<3x2x32xf32, #tpu.memory_space<vmem>>, vector<3x2x32xf32>
    %204 = vector.shape_cast %203 : vector<3x2x32xf32> to vector<6x32xf32>
    %c0_103 = arith.constant 0 : index
    %c0_104 = arith.constant 0 : index
    %205 = vector.load %arg8[%c0_103, %c0_104] : memref<32x128xf32, #tpu.memory_space<vmem>>, vector<32x128xf32>
    %cst_105 = arith.constant dense<0.000000e+00> : vector<6x128xf32>
    %206 = tpu.matmul %204, %205, %cst_105 {dimension_numbers = #tpu.dot_dimension_numbers<[1], [0], [0], [1], [0, 0, 1, 1], [], []>} : vector<6x32xf32>, vector<32x128xf32>, vector<6x128xf32> -> vector<6x128xf32>
    %c0_106 = arith.constant 0 : index
    %c0_107 = arith.constant 0 : index
    %207 = vector.load %arg9[%c0_106, %c0_107] : memref<1x128xf32, #tpu.memory_space<vmem>>, vector<1x128xf32>
    %208 = vector.broadcast %207 : vector<1x128xf32> to vector<6x128xf32>
    %209 = arith.addf %206, %208 : vector<6x128xf32>
    %c0_108 = arith.constant 0 : index
    %c0_109 = arith.constant 0 : index
    %210 = vector.load %arg2[%c0_108, %c0_109] : memref<6x6xf32, #tpu.memory_space<vmem>>, vector<6x6xf32>
    %c0_110 = arith.constant 0 : index
    %c0_111 = arith.constant 0 : index
    %211 = vector.load %arg10[%c0_110, %c0_111] : memref<6x128xf32, #tpu.memory_space<vmem>>, vector<6x128xf32>
    %cst_112 = arith.constant dense<0.000000e+00> : vector<6x128xf32>
    %212 = tpu.matmul %210, %211, %cst_112 {dimension_numbers = #tpu.dot_dimension_numbers<[1], [0], [0], [1], [0, 0, 1, 1], [], []>} : vector<6x6xf32>, vector<6x128xf32>, vector<6x128xf32> -> vector<6x128xf32>
    %213 = arith.addf %209, %212 : vector<6x128xf32>
    %c0_113 = arith.constant 0 : index
    %c0_114 = arith.constant 0 : index
    %214 = vector.load %arg13[%c0_113, %c0_114] : memref<6x128xf32, #tpu.memory_space<vmem>>, vector<6x128xf32>
    tpu.vector_store %arg13[%c0_113, %c0_114], %213 {strides = array<i32>} : memref<6x128xf32, #tpu.memory_space<vmem>>, vector<6x128xf32>,
    return
  }
  func.func @transform_0(%arg0: i32) -> (i32, i32) {
    %c0_i32 = arith.constant 0 : i32
    %c0_i32_0 = arith.constant 0 : i32
    return %arg0, %c0_i32 : i32, i32
  }
  func.func @transform_1(%arg0: i32) -> (i32, i32) {
    %c0_i32 = arith.constant 0 : i32
    %c0_i32_0 = arith.constant 0 : i32
    return %arg0, %c0_i32 : i32, i32
  }
  func.func @transform_2(%arg0: i32) -> (i32, i32) {
    %c0_i32 = arith.constant 0 : i32
    %c0_i32_0 = arith.constant 0 : i32
    %c0_i32_1 = arith.constant 0 : i32
    return %c0_i32, %c0_i32_0 : i32, i32
  }
  func.func @transform_3(%arg0: i32) -> (i32, i32) {
    %c0_i32 = arith.constant 0 : i32
    %c0_i32_0 = arith.constant 0 : i32
    %c0_i32_1 = arith.constant 0 : i32
    return %c0_i32, %c0_i32_0 : i32, i32
  }
  func.func @transform_4(%arg0: i32) -> (i32, i32, i32) {
    %c0_i32 = arith.constant 0 : i32
    %c0_i32_0 = arith.constant 0 : i32
    %c0_i32_1 = arith.constant 0 : i32
    %c0_i32_2 = arith.constant 0 : i32
    return %c0_i32, %c0_i32_0, %c0_i32_1 : i32, i32, i32
  }
  func.func @transform_5(%arg0: i32) -> (i32, i32, i32) {
    %c0_i32 = arith.constant 0 : i32
    %c0_i32_0 = arith.constant 0 : i32
    %c0_i32_1 = arith.constant 0 : i32
    %c0_i32_2 = arith.constant 0 : i32
    return %c0_i32, %c0_i32_0, %c0_i32_1 : i32, i32, i32
  }
  func.func @transform_6(%arg0: i32) -> (i32, i32, i32) {
    %c0_i32 = arith.constant 0 : i32
    %c0_i32_0 = arith.constant 0 : i32
    %c0_i32_1 = arith.constant 0 : i32
    %c0_i32_2 = arith.constant 0 : i32
    return %c0_i32, %c0_i32_0, %c0_i32_1 : i32, i32, i32
  }
  func.func @transform_7(%arg0: i32) -> (i32, i32) {
    %c0_i32 = arith.constant 0 : i32
    %c0_i32_0 = arith.constant 0 : i32
    %c0_i32_1 = arith.constant 0 : i32
    return %c0_i32, %c0_i32_0 : i32, i32
  }
  func.func @transform_8(%arg0: i32) -> (i32, i32) {
    %c0_i32 = arith.constant 0 : i32
    %c0_i32_0 = arith.constant 0 : i32
    %c0_i32_1 = arith.constant 0 : i32
    return %c0_i32, %c0_i32_0 : i32, i32
  }
  func.func @transform_9(%arg0: i32) -> (i32, i32) {
    %c0_i32 = arith.constant 0 : i32
    %c0_i32_0 = arith.constant 0 : i32
    %c0_i32_1 = arith.constant 0 : i32
    return %c0_i32, %c0_i32_0 : i32, i32
  }
  func.func @transform_10(%arg0: i32) -> (i32, i32, i32) {
    %c0_i32 = arith.constant 0 : i32
    %c0_i32_0 = arith.constant 0 : i32
    %c0_i32_1 = arith.constant 0 : i32
    %c0_i32_2 = arith.constant 0 : i32
    return %c0_i32, %c0_i32_0, %c0_i32_1 : i32, i32, i32
  }
  func.func @transform_11(%arg0: i32) -> (i32, i32, i32) {
    %c0_i32 = arith.constant 0 : i32
    %c0_i32_0 = arith.constant 0 : i32
    %c0_i32_1 = arith.constant 0 : i32
    %c0_i32_2 = arith.constant 0 : i32
    return %c0_i32, %c0_i32_0, %c0_i32_1 : i32, i32, i32
  }
  func.func @transform_12(%arg0: i32) -> (i32, i32) {
    %c0_i32 = arith.constant 0 : i32
    %c0_i32_0 = arith.constant 0 : i32
    return %arg0, %c0_i32 : i32, i32
  }
  func.func @transform_13(%arg0: i32) -> (i32, i32, i32) {
    %c0_i32 = arith.constant 0 : i32
    %c0_i32_0 = arith.constant 0 : i32
    %c0_i32_1 = arith.constant 0 : i32
    %c0_i32_2 = arith.constant 0 : i32
    return %c0_i32, %c0_i32_0, %c0_i32_1 : i32, i32, i32
  }
  func.func @transform_14(%arg0: i32) -> (i32, i32, i32) {
    %c0_i32 = arith.constant 0 : i32
    %c0_i32_0 = arith.constant 0 : i32
    %c0_i32_1 = arith.constant 0 : i32
    %c0_i32_2 = arith.constant 0 : i32
    return %c0_i32, %c0_i32_0, %c0_i32_1 : i32, i32, i32
  }
}

</mosaic_0001>

<bundles_post_ra>
// kernel: tpu_custom_call.1
= control target key start
LH: loop header
LB: loop body
LE: loop exit
PB: predicated region body
PF: predicated region fallthrough
CT: control target
= control target key end

     0   :  { %20 = vsyncpa [#allocation5], 0  ;;  %s2149_s0 = inlined_call_operand.vmem [shape: f32[6,70], index: 0, kind: input, shape index: {}]   ;;  %s2150_s1 = inlined_call_operand.vmem [shape: f32[6,6], index: 1, kind: input, shape index: {}]   ;;  %s2151_s2 = inlined_call_operand.vmem [shape: f32[70,32], index: 2, kind: input, shape index: {}]   ;;  %s2152_s3 = inlined_call_operand.hbm [shape: f32[1,32], index: 3, kind: input, shape index: {}]   ;;  %s2153_s4 = inlined_call_operand.vmem [shape: f32[2,32,128], index: 4, kind: input, shape index: {}]   ;;  %s2154_s5 = inlined_call_operand.hbm [shape: f32[2,32,128], index: 5, kind: input, shape index: {}]   ;;  %s2155_s6 = inlined_call_operand.vmem [shape: f32[2,1,128], index: 6, kind: input, shape index: {}]   ;;  %s2156_s7 = inlined_call_operand.vmem [shape: f32[32,128], index: 7, kind: input, shape index: {}]   ;;  %s2157_s8 = inlined_call_operand.vmem [shape: f32[1,128], index: 8, kind: input, shape index: {}]   ;;  %s2158_s9 = inlined_call_operand.vmem [shape: f32[6,128], index: 9, kind: input, shape index: {}]   ;;  %s2159_s10 = inlined_call_operand.vmem [shape: f32[2,2,32], index: 10, kind: input, shape index: {}]   ;;  %s2160_s11 = inlined_call_operand.vmem [shape: f32[2,2,32], index: 11, kind: input, shape index: {}]   ;;  %s2161_s12 = inlined_call_operand.hbm [shape: f32[6,128], index: 12, kind: output, shape index: {0}]   ;;  %s2162_s13 = inlined_call_operand.hbm [shape: f32[2,2,32], index: 13, kind: output, shape index: {1}]   ;;  %s2163_s14 = inlined_call_operand.hbm [shape: f32[2,2,32], index: 14, kind: output, shape index: {2}]  }
   0x1   :  { %21 = vsyncpa [#allocation8], 0 }
   0x2   :  { %22 = vsyncpa [#allocation6], 0 }
   0x3   :  { %23 = vsyncpa [#allocation11], 0  ;;  %s1788_s29 = smov [#allocation4]   ;;  %s1789_s15 = smov [#allocation7]  }
   0x4   :  { %s36_s30 = sshll.u32 %s1788_s29, 4  ;;  %s47_s16 = sshll.u32 %s1789_s15, 4  ;;  %s37_s30 = int_to_ptr.vmem [resolvable:$true] %s36_s30  ;;  %s1878_s16 = int_to_ptr.vmem [resolvable:$true] %s47_s16 }
   0x5   :  { %s1670_s19 = scalar_lea.hbm %s2152_s3, 16 }
   0x6   :  { %p1671_p0 = scmp.ne.s32.totalorder %s2152_s3, %s1670_s19  ;;  %p1674_p1 = scmp.lt.u32.totalorder %s1670_s19, %s2152_s3 }
   0x8   :  { %p1676_p2 = pnand %p1674_p1, %p1671_p0 }
   0xa   :  { %1679 = shalt.err (!%p1676_p2)
}
   0xb   :  { %s1680_s24 = scalar_lea.vmem %s37_s30, 16  ;;  %s1684_s25 = scalar_lea.vmem %s37_s30, 32 }
   0xc   :  { %p1681_p3 = scmp.ne.s32.totalorder %s37_s30, %s1680_s24  ;;  %p1685_p4 = scmp.lt.s32.totalorder %s37_s30, %s37_s30 }
   0xd   :  { %p1686_p5 = scmp.lt.s32.totalorder %s1684_s25, %s1680_s24 }
   0xf   :  { %p1687_p6 = por %p1686_p5, %p1685_p4 }
  0x11   :  { %p1688_p7 = pnand %p1687_p6, %p1681_p3 }
  0x13   :  { %1691 = shalt.err (!%p1688_p7)
}
  0x14   :  { %39 = dma.hbm_to_vmem [thread:$0]  %s2152_s3, 16, %s37_s30, [#allocation5]  }
  0x15   :  { %s1692_s15 = scalar_lea.hbm %s2154_s5, 1024 }
  0x16   :  { %p1693_p8 = scmp.ne.s32.totalorder %s2154_s5, %s1692_s15  ;;  %p1696_p9 = scmp.lt.u32.totalorder %s1692_s15, %s2154_s5 }
  0x18   :  { %p1698_p10 = pnand %p1696_p9, %p1693_p8 }
  0x1a   :  { %1701 = shalt.err (!%p1698_p10)
}
  0x1b   :  { %s1702_s21 = scalar_lea.vmem %s1878_s16, 1024  ;;  %p1707_p12 = scmp.lt.s32.totalorder %s1878_s16, %s1878_s16 }
  0x1c   :  { %p1703_p11 = scmp.ne.s32.totalorder %s1878_s16, %s1702_s21  ;;  %p1708_p13 = scmp.lt.s32.totalorder %s1702_s21, %s1702_s21 }
  0x1e   :  { %p1709_p0 = por %p1708_p13, %p1707_p12 }
  0x20   :  { %p1710_p1 = pnand %p1709_p0, %p1703_p11 }
  0x22   :  { %1713 = shalt.err (!%p1710_p1)
}
  0x23   :  { %s1790_s3 = smov 128   ;;  %s1791_s30 = smov 8  }
  0x24   :  { %53 = dma.hbm_to_vmem [thread:$0]  %s2154_s5, 1024, %s1878_s16, [#allocation8], %s1790_s3, %s1790_s3, %s1791_s30  }
  0x25   :  { %1780 = dma.done.wait [#allocation5], 16  }
  0x26   :  { %1781 = vsyncadd [#allocation5], 4294967280 }
  0x27   :  { %1782 = dma.done.wait [#allocation8], 1024  }
  0x28   :  { %1783 = vsyncadd [#allocation8], 4294966272  ;;  %v1792_v0 = vmov 0.0|0.0   ;;  %vm1793_vm0 = vmmov 0   ;;  %v1794_v1 = vmov 0.0   ;;  %v86_v2 = vld [vmem:[%s2151_s2] sm:$0xff]  ;;  %v281_v42 = vlaneseq }
  0x29   :  { %1535 = vmatprep.subr.bf16.mxu0 %v1792_v0  ;;  %1428 = vmatprep.mubr.msk.f32.mxu0 %vm1793_vm0, %v1794_v1  ;;  %v87_v3 = vld [vmem:[%s2151_s2 + $0x8] sm:$0xff]  ;;  %v88_v4 = vld [vmem:[%s2151_s2 + $0x10] sm:$0xff]  ;;  %v89_v6 = vld [vmem:[%s2151_s2 + $0x18] sm:$0xff]  ;;  %vm106_vm1 = vcmask 1045504   ;;  %vm102_vm2 = vcmask 572416   ;;  %vm78_vm3 = vcmask 254976  }
  0x2a   :  { %1547 = vmatprep.subr.bf16.mxu1 %v1792_v0  ;;  %1439 = vmatprep.mubr.msk.f32.mxu1 %vm1793_vm0, %v1794_v1  ;;  %v1536_v5 = vpack.c.bf16 %v87_v3, %v86_v2  ;;  %v1539_v7 = vpack.c.bf16 %v89_v6, %v88_v4  ;;  %v90_v8 = vld [vmem:[%s2151_s2 + $0x20] sm:$0xff]  ;;  %v91_v9 = vld [vmem:[%s2151_s2 + $0x28] sm:$0xff]  ;;  %v92_v11 = vld [vmem:[%s2151_s2 + $0x30] sm:$0xff]  ;;  %vm202_vm4 = vcmask 261120   ;;  %v1795_v40 = vmov 1983009808  }
  0x2b   :  { %v1542_v10 = vpack.c.bf16 %v91_v9, %v90_v8  ;;  %v93_v12 = vld [vmem:[%s2151_s2 + $0x38] sm:$0xff]  ;;  %v94_v14 = vld [vmem:[%s2151_s2 + $0x40] sm:$0x3f]  ;;  %v192_v17 = vld [vmem:[%s2153_s4 + $0x8] sm:$0xff]  ;;  %v279_v41 = vunpack.c.l.s4 %v1795_v40  ;;  %v282_v44 = vshrl.u32 %v281_v42, 7  ;;  %s1796_s3 = smov 64  }
  0x2c   :  { %1537 = vmatpush3.bf16.msra.mxu0 %v1536_v5  ;;  %v1545_v13 = vpack.c.bf16 %v93_v12, %v92_v11  ;;  %v85_v15 = vld [vmem:[%s2149_s0] sm:$0x3f]  ;;  %v193_v19 = vld [vmem:[%s2153_s4 + $0x10] sm:$0xff]  ;;  %v194_v20 = vld [vmem:[%s2153_s4 + $0x18] sm:$0xff]  ;;  %s1797_s30 = smov 32   ;;  %vm1192_vm5 = vcmask 48128  }
  0x2d   :  { %1538 = vmatprep.subr.bf16.mxu0 %v1792_v0  ;;  %v191_v16 = vld [vmem:[%s2153_s4] sm:$0xff]  ;;  %v1551_v21 = vpack.c.bf16 %v194_v20, %v193_v19  ;;  %v187_v22 = vld [vmem:[#allocation7] sm:$0xff]  ;;  %v188_v23 = vld [vmem:[#allocation7 + $0x8] sm:$0xff]  ;;  %v280_v43 = vunpack.c.0.s8 %v279_v41 }
  0x2e   :  { %v1548_v18 = vpack.c.bf16 %v192_v17, %v191_v16  ;;  %v1554_v24 = vpack.c.bf16 %v188_v23, %v187_v22  ;;  %v76_v25 = vld [vmem:[%s2159_s10] sm:$0x3]  ;;  %v190_v27 = vld [vmem:[#allocation7 + $0x18] sm:$0xff] }
  0x2f   :  { %79 = vst.msk [vmem:[#allocation10] sm:$0x3] %vm78_vm3, %v76_v25  ;;  %v189_v26 = vld [vmem:[#allocation7 + $0x10] sm:$0xff]  ;;  %v1318_v29 = vld [vmem:[#allocation4] ss:$0 sm:$0xff]  ;;  %v1990_v46 = vsub.s32 %v280_v43, %v282_v44 }
  0x30   :  { %1540 = vmatpush3.bf16.msra.mxu0 %v1539_v7  ;;  %1549 = vmatpush3.bf16.msra.mxu1 %v1548_v18  ;;  %v1557_v28 = vpack.c.bf16 %v190_v27, %v189_v26  ;;  %v81_v39 = vld [vmem:[%s2160_s11] sm:$0x3] }
  0x31   :  { %1541 = vmatprep.subr.bf16.mxu0 %v1792_v0  ;;  %1550 = vmatprep.subr.bf16.mxu1 %v1792_v0  ;;  %83 = vst.msk [vmem:[#allocation12] sm:$0x3] %vm78_vm3, %v81_v39  ;;  %v1322_v45 = vld [vmem:[%s2155_s6] ss:$0 sm:$0xff] }
  0x32   :  { %v1332_v44 = vld [vmem:[%s2153_s4 + $0x20] sm:$0xff] }
  0x34   :  { %1543 = vmatpush3.bf16.msra.mxu0 %v1542_v10  ;;  %1552 = vmatpush3.bf16.msra.mxu1 %v1551_v21 }
  0x35   :  { %1544 = vmatprep.subr.bf16.mxu0 %v1792_v0  ;;  %1553 = vmatprep.subr.bf16.mxu1 %v1792_v0 }
  0x36   :  { %v299_v38 = vld [vmem:[#allocation10] sm:$0x3] }
  0x38   :  { %1546 = vmatpush3.bf16.msra.mxu0 %v1545_v13  ;;  %v300_v58 = vld [vmem:[#allocation12] sm:$0x3] }
  0x39   :  { %1426 = vmatprep.subr.mxu0 %v1794_v1 }
  0x3c   :  { %1427 = vmatpush3.msk.msra.mxu0 %vm106_vm1, %v94_v14 }
  0x3d   :  { %1429 = vmatmul.mubr.msk.f32.vlgmr.msra.gmra.mrb[0].mxu0 %vm102_vm2, %v85_v15  ;;  %1565 = vmatprep.subr.bf16.mxu0 %v1792_v0 }
  0x3e   :  { %1472 = vmatprep.mubr.msk.f32.mxu0 %vm1793_vm0, %v1794_v1  ;;  %1567 = vmatpush3.bf16.msra.mxu0 %v1554_v24 }
  0x3f   :  { %1568 = vmatprep.subr.bf16.mxu0 %v1792_v0 }
  0x42   :  { %1570 = vmatpush3.bf16.msra.mxu0 %v1557_v28 }
  0x43   :  { %1577 = vmatprep.subr.bf16.mxu0 %v1792_v0 }
 0x110   :  { %v176_v30 = vpop.f32.mrb[0].mxu0 }
 0x111   :  { %v177_v31 = vadd.f32 %v1318_v29, %v176_v30  ;;  %v1430_v32 = vpop.f32.mrb[1].mxu0 }
 0x113   :  { %v1321_v33 = vmul.f32 -1.442695, %v177_v31 }
 0x115   :  { %1618 = vpow2.f32 %v1321_v33 }
 0x11f   :  { %v1619_v34 = vpop.eup %1618 }
 0x120   :  { %v183_v35 = vadd.f32 1.0, %v1619_v34 }
 0x122   :  { %1620 = vrcp.f32 %v183_v35 }
 0x12c   :  { %v1621_v36 = vpop.eup %1620 }
 0x12d   :  { %v186_v37 = vmul.f32 %v1621_v36, %v177_v31 }
 0x12f   :  { %1440 = vmatmul.mubr.msk.f32.vlgmr.msra.gmra.mrb[0].mxu1 %vm202_vm4, %v186_v37 }
 0x130   :  { %1555 = vmatpush3.bf16.msra.mxu1 %v1554_v24  ;;  %1450 = vmatprep.mubr.msk.f32.mxu1 %vm1793_vm0, %v1794_v1 }
 0x131   :  { %1556 = vmatprep.subr.bf16.mxu1 %v1792_v0 }
 0x134   :  { %1558 = vmatpush3.bf16.msra.mxu1 %v1557_v28 }
 0x135   :  { %1559 = vmatprep.subr.bf16.mxu1 %v1792_v0 }
 0x137   :  { %1451 = vmatmul.mubr.msk.f32.vlgmr.msra.gmra.mrb[2].mxu1 %vm202_vm4, %v299_v38 }
 0x138   :  { %1561 = vmatpush3.bf16.msra.mxu1 %v1554_v24  ;;  %1461 = vmatprep.mubr.msk.f32.mxu1 %vm1793_vm0, %v1794_v1 }
 0x139   :  { %1562 = vmatprep.subr.bf16.mxu1 %v1792_v0 }
 0x13c   :  { %1564 = vmatpush3.bf16.msra.mxu1 %v1557_v28 }
 0x13d   :  { %1571 = vmatprep.subr.bf16.mxu1 %v1792_v0 }
 0x202   :  { %v272_v47 = vpop.f32.mrb[0].mxu1 }
 0x203   :  { %v273_v48 = vadd.f32 %v1322_v45, %v272_v47  ;;  %v1441_v49 = vpop.f32.mrb[1].mxu1  ;;  %v1333_v45 = vld [vmem:[%s2153_s4 + $0x28] sm:$0xff]  ;;  %v1334_v47 = vld [vmem:[%s2153_s4 + $0x30] sm:$0xff] }
 0x204   :  { %v1335_v49 = vld [vmem:[%s2153_s4 + $0x38] sm:$0xff] }
 0x205   :  { %v277_v50 = vcombine.high %v273_v48, %v273_v48  ;;  %v284_v51 = vrot.slane %v273_v48, %v1990_v46  ;;  %1324 = vst.sshfl [vmem:[#allocation3] sm:$0x3 pattern:$0x76325410] %v273_v48  ;;  %v1572_v48 = vpack.c.bf16 %v1333_v45, %v1332_v44 }
 0x207   :  { %v292_v52 = vcombine.high %v284_v51, %v284_v51  ;;  %1325 = vst.sshfl [vmem:[#allocation3 + $0x4] sm:$0x3 pattern:$0x76325410] %v277_v50  ;;  %v1575_v50 = vpack.c.bf16 %v1335_v49, %v1334_v47  ;;  %v630_v51 = vld [vmem:[#allocation7 + $0x20] sm:$0xff] }
 0x209   :  { %297 = vst [vmem:[#allocation3 + $0x2] sm:$0x3] %v292_v52  ;;  %v631_v52 = vld [vmem:[#allocation7 + $0x28] sm:$0xff] }
 0x20a   :  { %v371_v53 = vpop.f32.mrb[2].mxu1 }
 0x20b   :  { %v1452_v54 = vpop.f32.mrb[3].mxu1 }
 0x20c   :  { %v301_v55 = vld [vmem:[#allocation3] sm:$0x3]  ;;  %v1578_v54 = vpack.c.bf16 %v631_v52, %v630_v51 }
 0x20d   :  { %v375_v56 = vadd.f32 %v371_v53, %v301_v55  ;;  %v632_v55 = vld [vmem:[#allocation7 + $0x30] sm:$0xff] }
 0x20e   :  { %v516_v29 = vld [vmem:[#allocation3 + $0x4] sm:$0x3] }
 0x20f   :  { %1622 = vtanh.f32 %v375_v56  ;;  %v1327_v59 = vmul.f32 -1.442695, %v375_v56  ;;  %v633_v56 = vld [vmem:[#allocation7 + $0x38] sm:$0xff] }
 0x210   :  { %v411_v11 = vld [vmem:[#allocation3 + $0x2] sm:$0x3] }
 0x211   :  { %1624 = vpow2.f32 %v1327_v59  ;;  %v82_v59 = vld [vmem:[%s2160_s11 + $0x2] sm:$0x3] }
 0x212   :  { %84 = vst.msk [vmem:[#allocation12 + $0x2] sm:$0x3] %vm78_vm3, %v82_v59 }
 0x219   :  { %v1623_v57 = vpop.eup %1622 }
 0x21a   :  { %389 = vrot.lane.b32.xlu0 %v1623_v57, %s1796_s3  ;;  %v77_v57 = vld [vmem:[%s2159_s10 + $0x2] sm:$0x3] }
 0x21b   :  { %v1625_v60 = vpop.eup %1624  ;;  %80 = vst.msk [vmem:[#allocation10 + $0x2] sm:$0x3] %vm78_vm3, %v77_v57 }
 0x21c   :  { %v379_v61 = vadd.f32 1.0, %v1625_v60  ;;  %v1581_v60 = vpack.c.bf16 %v633_v56, %v632_v55 }
 0x21e   :  { %384 = vrot.lane.b32.xlu0 %v300_v58, %s1797_s30  ;;  %1626 = vrcp.f32 %v379_v61 }
 0x222   :  { %v762_v61 = vld [vmem:[#allocation10 + $0x2] sm:$0x3] }
 0x228   :  { %v1627_v62 = vpop.eup %1626 }
 0x28c   :  { %v390_v63 = vpop.permute.xlu0 %389 }
 0x28d   :  { %v392_v2 = vmul.f32 %v1627_v62, %v390_v63 }
 0x28f   :  { %394 = vrot.lane.b32.xlu1 %v392_v2, %s1797_s30 }
 0x290   :  { %v385_v3 = vpop.permute.xlu0 %384 }
 0x291   :  { %v387_v4 = vmul.f32 %v1627_v62, %v385_v3 }
 0x301   :  { %v395_v5 = vpop.permute.xlu1 %394 }
 0x302   :  { %v397_v6 = vadd.f32 %v395_v5, %v387_v4 }
 0x304   :  { %1628 = vtanh.f32 %v397_v6 }
 0x30e   :  { %v1629_v7 = vpop.eup %1628 }
 0x30f   :  { %400 = vrot.lane.b32.xlu1 %v1629_v7, %s1796_s3 }
 0x381   :  { %v401_v8 = vpop.permute.xlu1 %400 }
 0x382   :  { %v403_v9 = vmul.f32 %v1627_v62, %v401_v8  ;;  %v764_v62 = vld [vmem:[#allocation12 + $0x2] sm:$0x3] }
 0x384   :  { %405 = vrot.lane.b32.xlu0 %v403_v9, %s1797_s30 }
 0x3f6   :  { %v406_v10 = vpop.permute.xlu0 %405 }
 0x3f7   :  { %409 = vst.msk [vmem:[#allocation2] sm:$0x3] %vm78_vm3, %v406_v10  ;;  %1462 = vmatmul.mubr.msk.f32.vlgmr.msra.gmra.mrb[4].mxu1 %vm202_vm4, %v406_v10  ;;  %v1337_v10 = vld [vmem:[%s2155_s6 + $0x1] ss:$0 sm:$0xff]  ;;  %s1798_s6 = smov 96  }
 0x3f8   :  { %1483 = vmatprep.mubr.msk.f32.mxu1 %vm1793_vm0, %v1794_v1  ;;  %1573 = vmatpush3.bf16.msra.mxu1 %v1572_v48 }
 0x3f9   :  { %1574 = vmatprep.subr.bf16.mxu1 %v1792_v0 }
 0x3fc   :  { %1576 = vmatpush3.bf16.msra.mxu1 %v1575_v50 }
 0x3fd   :  { %1583 = vmatprep.subr.bf16.mxu1 %v1792_v0 }
 0x3fe   :  { %v626_v3 = vld [vmem:[#allocation2] sm:$0x3] }
 0x4ca   :  { %v480_v12 = vpop.f32.mrb[4].mxu1 }
 0x4cb   :  { %v484_v13 = vadd.f32 %v480_v12, %v411_v11  ;;  %v1463_v14 = vpop.f32.mrb[5].mxu1 }
 0x4cd   :  { %1630 = vtanh.f32 %v484_v13  ;;  %v1329_v16 = vmul.f32 -1.442695, %v484_v13 }
 0x4cf   :  { %1632 = vpow2.f32 %v1329_v16 }
 0x4d7   :  { %v1631_v15 = vpop.eup %1630 }
 0x4d8   :  { %494 = vrot.lane.b32.xlu1 %v1631_v15, %s1796_s3 }
 0x4d9   :  { %v1633_v17 = vpop.eup %1632 }
 0x4da   :  { %v488_v18 = vadd.f32 1.0, %v1633_v17 }
 0x4dc   :  { %1634 = vrcp.f32 %v488_v18 }
 0x4e6   :  { %v1635_v19 = vpop.eup %1634 }
 0x4e7   :  { %v492_v22 = vmul.f32 %v1635_v19, %v397_v6 }
 0x54a   :  { %v495_v20 = vpop.permute.xlu1 %494 }
 0x54b   :  { %v497_v21 = vmul.f32 %v1635_v19, %v495_v20 }
 0x54d   :  { %499 = vrot.lane.b32.xlu0 %v497_v21, %s1797_s30 }
 0x5bf   :  { %v500_v23 = vpop.permute.xlu0 %499 }
 0x5c0   :  { %v502_v24 = vadd.f32 %v500_v23, %v492_v22 }
 0x5c2   :  { %1636 = vtanh.f32 %v502_v24 }
 0x5cc   :  { %v1637_v25 = vpop.eup %1636 }
 0x5cd   :  { %505 = vrot.lane.b32.xlu1 %v1637_v25, %s1796_s3 }
 0x63f   :  { %v506_v26 = vpop.permute.xlu1 %505 }
 0x640   :  { %v508_v27 = vmul.f32 %v1635_v19, %v506_v26 }
 0x642   :  { %510 = vrot.lane.b32.xlu0 %v508_v27, %s1797_s30 }
 0x6b4   :  { %v511_v28 = vpop.permute.xlu0 %510 }
 0x6b5   :  { %514 = vst.msk [vmem:[#allocation2 + $0x2] sm:$0x3] %vm78_vm3, %v511_v28  ;;  %1473 = vmatmul.mubr.msk.f32.vlgmr.msra.gmra.mrb[2].mxu0 %vm202_vm4, %v511_v28 }
 0x6b6   :  { %1494 = vmatprep.mubr.msk.f32.mxu0 %vm1793_vm0, %v1794_v1  ;;  %1579 = vmatpush3.bf16.msra.mxu0 %v1578_v54 }
 0x6b7   :  { %1580 = vmatprep.subr.bf16.mxu0 %v1792_v0 }
 0x6ba   :  { %1582 = vmatpush3.bf16.msra.mxu0 %v1581_v60 }
 0x6bb   :  { %1589 = vmatprep.subr.bf16.mxu0 %v1792_v0 }
 0x6bc   :  { %v627_v2 = vld [vmem:[#allocation2 + $0x2] sm:$0x3] }
 0x6bd   :  { %1495 = vmatmul.mubr.msk.f32.vlgmr.msra.gmra.mrb[4].mxu0 %vm202_vm4, %v762_v61  ;;  %v650_v4 = vcombine.low %v626_v3, %v627_v2 }
 0x6be   :  { %1591 = vmatpush3.bf16.msra.mxu0 %v1578_v54  ;;  %1516 = vmatprep.mubr.msk.f32.mxu0 %vm1793_vm0, %v1794_v1 }
 0x6bf   :  { %1592 = vmatprep.subr.bf16.mxu0 %v1792_v0  ;;  %v657_v5 = vrot.slane %v650_v4, %v1990_v46 }
 0x6c2   :  { %1594 = vmatpush3.bf16.msra.mxu0 %v1581_v60 }
 0x6c3   :  { %1530 = vmatprep.subr.mxu0 %v1794_v1 }
 0x788   :  { %v585_v30 = vpop.f32.mrb[2].mxu0 }
 0x789   :  { %v589_v31 = vadd.f32 %v585_v30, %v516_v29  ;;  %v1474_v32 = vpop.f32.mrb[3].mxu0 }
 0x78b   :  { %1638 = vtanh.f32 %v589_v31  ;;  %v1331_v34 = vmul.f32 -1.442695, %v589_v31 }
 0x78d   :  { %1640 = vpow2.f32 %v1331_v34 }
 0x790   :  { %v835_v8 = vpop.f32.mrb[4].mxu0 }
 0x791   :  { %v1496_v9 = vpop.f32.mrb[5].mxu0 }
 0x792   :  { %v1090_v9 = vld [vmem:[%s2156_s7 + $0x10] sm:$0xff] }
 0x795   :  { %v1639_v33 = vpop.eup %1638 }
 0x796   :  { %599 = vrot.lane.b32.xlu1 %v1639_v33, %s1796_s3 }
 0x797   :  { %v1641_v35 = vpop.eup %1640 }
 0x798   :  { %v593_v36 = vadd.f32 1.0, %v1641_v35 }
 0x79a   :  { %1642 = vrcp.f32 %v593_v36 }
 0x7a4   :  { %v1643_v37 = vpop.eup %1642 }
 0x7a5   :  { %v597_v40 = vmul.f32 %v1643_v37, %v502_v24 }
 0x808   :  { %v600_v38 = vpop.permute.xlu1 %599 }
 0x809   :  { %v602_v39 = vmul.f32 %v1643_v37, %v600_v38 }
 0x80b   :  { %604 = vrot.lane.b32.xlu0 %v602_v39, %s1797_s30 }
 0x87d   :  { %v605_v41 = vpop.permute.xlu0 %604 }
 0x87e   :  { %v2012_v42 = vadd.f32 %v605_v41, %v597_v40 }
 0x880   :  { %1644 = vtanh.f32 %v2012_v42 }
 0x88a   :  { %v1645_v43 = vpop.eup %1644 }
 0x88b   :  { %610 = vrot.lane.b32.xlu1 %v1645_v43, %s1796_s3 }
 0x8fd   :  { %v611_v53 = vpop.permute.xlu1 %610 }
 0x8fe   :  { %v613_v58 = vmul.f32 %v1643_v37, %v611_v53 }
 0x900   :  { %615 = vrot.lane.b32.xlu0 %v613_v58, %s1797_s30 }
 0x904   :  { %848 = vrot.lane.b32.xlu0 %v764_v62, %s1797_s30 }
 0x972   :  { %v616_v63 = vpop.permute.xlu0 %615 }
 0x973   :  { %619 = vst.msk [vmem:[#allocation2 + $0x4] sm:$0x3] %vm78_vm3, %v616_v63  ;;  %620 = vst.msk [vmem:[#allocation10] sm:$0x3] %vm78_vm3, %v616_v63 }
 0x976   :  { %v849_v26 = vpop.permute.xlu0 %848 }
 0x97a   :  { %v1338_v6 = vld.sshfl [vmem:[#allocation2 + $0x4] sm:$0x3 pattern:$0x76325410] }
 0x97b   :  { %v665_v7 = vcombine.low %v657_v5, %v1338_v6  ;;  %v1088_v6 = vld [vmem:[%s2156_s7] sm:$0xff] }
 0x97d   :  { %1484 = vmatmul.mubr.msk.f32.vlgmr.msra.gmra.mrb[6].mxu1 %vm202_vm4, %v665_v7  ;;  %v1089_v7 = vld [vmem:[%s2156_s7 + $0x8] sm:$0xff] }
 0x97e   :  { %1585 = vmatpush3.bf16.msra.mxu1 %v1578_v54  ;;  %1505 = vmatprep.mubr.msk.f32.mxu1 %vm1793_vm0, %v1794_v1 }
 0x97f   :  { %1586 = vmatprep.subr.bf16.mxu1 %v1792_v0 }
 0x982   :  { %1588 = vmatpush3.bf16.msra.mxu1 %v1581_v60 }
 0x983   :  { %1595 = vmatprep.subr.bf16.mxu1 %v1792_v0 }
 0xa50   :  { %v734_v11 = vpop.f32.mrb[6].mxu1 }
 0xa51   :  { %v735_v12 = vadd.f32 %v1337_v10, %v734_v11  ;;  %v1485_v13 = vpop.f32.mrb[7].mxu1  ;;  %v1191_v10 = vld [vmem:[%s2158_s9] sm:$0x3f] }
 0xa53   :  { %v739_v14 = vcombine.high %v735_v12, %v735_v12  ;;  %v746_v15 = vrot.slane %v735_v12, %v1990_v46  ;;  %1340 = vst.sshfl [vmem:[#allocation3] sm:$0x3 pattern:$0x76325410] %v735_v12 }
 0xa55   :  { %v754_v16 = vcombine.high %v746_v15, %v746_v15  ;;  %1341 = vst.sshfl [vmem:[#allocation3 + $0x4] sm:$0x3 pattern:$0x76325410] %v739_v14 }
 0xa57   :  { %759 = vst [vmem:[#allocation3 + $0x2] sm:$0x3] %v754_v16 }
 0xa5a   :  { %v765_v17 = vld [vmem:[#allocation3] sm:$0x3] }
 0xa5b   :  { %v839_v18 = vadd.f32 %v835_v8, %v765_v17  ;;  %v1596_v8 = vpack.c.bf16 %v1089_v7, %v1088_v6 }
 0xa5c   :  { %v976_v54 = vld [vmem:[#allocation3 + $0x4] sm:$0x3] }
 0xa5d   :  { %1646 = vtanh.f32 %v839_v18  ;;  %v1343_v20 = vmul.f32 -1.442695, %v839_v18 }
 0xa5e   :  { %v873_v34 = vld [vmem:[#allocation3 + $0x2] sm:$0x3] }
 0xa5f   :  { %1648 = vpow2.f32 %v1343_v20 }
 0xa67   :  { %v1647_v19 = vpop.eup %1646 }
 0xa68   :  { %853 = vrot.lane.b32.xlu1 %v1647_v19, %s1796_s3 }
 0xa69   :  { %v1649_v21 = vpop.eup %1648 }
 0xa6a   :  { %v843_v22 = vadd.f32 1.0, %v1649_v21 }
 0xa6c   :  { %1650 = vrcp.f32 %v843_v22 }
 0xa76   :  { %v1651_v23 = vpop.eup %1650 }
 0xa77   :  { %v851_v27 = vmul.f32 %v1651_v23, %v849_v26 }
 0xada   :  { %v854_v24 = vpop.permute.xlu1 %853 }
 0xadb   :  { %v856_v25 = vmul.f32 %v1651_v23, %v854_v24 }
 0xadd   :  { %858 = vrot.lane.b32.xlu1 %v856_v25, %s1797_s30 }
 0xb4f   :  { %v859_v28 = vpop.permute.xlu1 %858 }
 0xb50   :  { %v861_v29 = vadd.f32 %v859_v28, %v851_v27 }
 0xb52   :  { %1652 = vtanh.f32 %v861_v29 }
 0xb5c   :  { %v1653_v30 = vpop.eup %1652 }
 0xb5d   :  { %864 = vrot.lane.b32.xlu0 %v1653_v30, %s1796_s3 }
 0xbcf   :  { %v865_v31 = vpop.permute.xlu0 %864 }
 0xbd0   :  { %v867_v32 = vmul.f32 %v1651_v23, %v865_v31 }
 0xbd2   :  { %869 = vrot.lane.b32.xlu1 %v867_v32, %s1797_s30 }
 0xc44   :  { %v870_v33 = vpop.permute.xlu1 %869 }
 0xc45   :  { %872 = vst.msk [vmem:[#allocation2] sm:$0x3] %vm78_vm3, %v870_v33  ;;  %1506 = vmatmul.mubr.msk.f32.vlgmr.msra.gmra.mrb[8].mxu1 %vm202_vm4, %v870_v33 }
 0xc46   :  { %1527 = vmatprep.mubr.msk.f32.mxu1 %vm1793_vm0, %v1794_v1  ;;  %1597 = vmatpush3.bf16.msra.mxu1 %v1596_v8 }
 0xc47   :  { %1598 = vmatprep.subr.bf16.mxu1 %v1792_v0  ;;  %v1190_v0 = vld [vmem:[%s2150_s1] sm:$0x3f]  ;;  %s1799_s1 = smov [#allocation10]  }
 0xc4c   :  { %v1085_v17 = vld [vmem:[#allocation2] sm:$0x3] }
 0xd18   :  { %v942_v35 = vpop.f32.mrb[8].mxu1 }
 0xd19   :  { %v946_v36 = vadd.f32 %v942_v35, %v873_v34  ;;  %v1507_v37 = vpop.f32.mrb[9].mxu1 }
 0xd1b   :  { %1654 = vtanh.f32 %v946_v36  ;;  %v1345_v39 = vmul.f32 -1.442695, %v946_v36 }
 0xd1d   :  { %1656 = vpow2.f32 %v1345_v39 }
 0xd25   :  { %v1655_v38 = vpop.eup %1654 }
 0xd26   :  { %956 = vrot.lane.b32.xlu0 %v1655_v38, %s1796_s3 }
 0xd27   :  { %v1657_v40 = vpop.eup %1656 }
 0xd28   :  { %v950_v41 = vadd.f32 1.0, %v1657_v40 }
 0xd2a   :  { %1658 = vrcp.f32 %v950_v41 }
 0xd34   :  { %v1659_v43 = vpop.eup %1658 }
 0xd35   :  { %v954_v47 = vmul.f32 %v1659_v43, %v861_v29 }
 0xd98   :  { %v957_v44 = vpop.permute.xlu0 %956 }
 0xd99   :  { %v959_v45 = vmul.f32 %v1659_v43, %v957_v44 }
 0xd9b   :  { %961 = vrot.lane.b32.xlu1 %v959_v45, %s1797_s30 }
 0xe0d   :  { %v962_v48 = vpop.permute.xlu1 %961 }
 0xe0e   :  { %v964_v49 = vadd.f32 %v962_v48, %v954_v47 }
 0xe10   :  { %1660 = vtanh.f32 %v964_v49 }
 0xe1a   :  { %v1661_v50 = vpop.eup %1660 }
 0xe1b   :  { %967 = vrot.lane.b32.xlu0 %v1661_v50, %s1796_s3 }
 0xe8d   :  { %v968_v51 = vpop.permute.xlu0 %967 }
 0xe8e   :  { %v970_v52 = vmul.f32 %v1659_v43, %v968_v51 }
 0xe90   :  { %972 = vrot.lane.b32.xlu1 %v970_v52, %s1797_s30 }
 0xf02   :  { %v973_v53 = vpop.permute.xlu1 %972 }
 0xf03   :  { %975 = vst.msk [vmem:[#allocation2 + $0x2] sm:$0x3] %vm78_vm3, %v973_v53  ;;  %1517 = vmatmul.mubr.msk.f32.vlgmr.msra.gmra.mrb[6].mxu0 %vm202_vm4, %v973_v53 }
 0xf04   :  { %1532 = vmatprep.mubr.msk.f32.mxu0 %vm1793_vm0, %v1794_v1  ;;  %1531 = vmatpush3.msk.msra.mxu0 %vm106_vm1, %v1191_v10 }
 0xf07   :  { %1533 = vmatmul.mubr.msk.f32.vlgmr.msra.gmra.mrb[8].mxu0 %vm1192_vm5, %v1190_v0 }
 0xf0a   :  { %v1086_v16 = vld [vmem:[#allocation2 + $0x2] sm:$0x3] }
 0xf0b   :  { %v1102_v18 = vcombine.low %v1085_v17, %v1086_v16 }
 0xf0d   :  { %v1109_v20 = vrot.slane %v1102_v18, %v1990_v46 }
 0xfd6   :  { %v1045_v55 = vpop.f32.mrb[6].mxu0 }
 0xfd7   :  { %v1049_v56 = vadd.f32 %v1045_v55, %v976_v54  ;;  %v1518_v57 = vpop.f32.mrb[7].mxu0 }
 0xfd9   :  { %1662 = vtanh.f32 %v1049_v56  ;;  %v1347_v59 = vmul.f32 -1.442695, %v1049_v56 }
 0xfda   :  { %v1265_v23 = vpop.f32.mrb[8].mxu0 }
 0xfdb   :  { %1664 = vpow2.f32 %v1347_v59  ;;  %v1534_v24 = vpop.f32.mrb[9].mxu0 }
 0xfe3   :  { %v1663_v58 = vpop.eup %1662 }
 0xfe4   :  { %1059 = vrot.lane.b32.xlu0 %v1663_v58, %s1796_s3 }
 0xfe5   :  { %v1665_v60 = vpop.eup %1664 }
 0xfe6   :  { %v1053_v61 = vadd.f32 1.0, %v1665_v60 }
 0xfe8   :  { %1666 = vrcp.f32 %v1053_v61 }
 0xff2   :  { %v1667_v62 = vpop.eup %1666 }
 0xff3   :  { %v1057_v3 = vmul.f32 %v1667_v62, %v964_v49 }
0x1056   :  { %v1060_v63 = vpop.permute.xlu0 %1059 }
0x1057   :  { %v1062_v2 = vmul.f32 %v1667_v62, %v1060_v63 }
0x1059   :  { %1064 = vrot.lane.b32.xlu1 %v1062_v2, %s1797_s30 }
0x10cb   :  { %v1065_v1 = vpop.permute.xlu1 %1064 }
0x10cc   :  { %v1067_v4 = vadd.f32 %v1065_v1, %v1057_v3 }
0x10ce   :  { %1668 = vtanh.f32 %v1067_v4 }
0x10d8   :  { %v1669_v5 = vpop.eup %1668 }
0x10d9   :  { %1070 = vrot.lane.b32.xlu0 %v1669_v5, %s1796_s3 }
0x10dd   :  { %622 = vrot.lane.b32.xlu0 %v2012_v42, %s1798_s6  ;;  %v1091_v42 = vld [vmem:[%s2156_s7 + $0x18] sm:$0xff]  ;;  %s1286_s7 = sshll.u32 %s1799_s1, 4  ;;  %s1287_s7 = int_to_ptr.vmem [resolvable:$true] %s1286_s7 }
0x10de   :  { %v1599_v11 = vpack.c.bf16 %v1091_v42, %v1090_v9  ;;  %s1714_s9 = scalar_lea.vmem %s1287_s7, 64  ;;  %p1719_p3 = scmp.lt.s32.totalorder %s1287_s7, %s1287_s7 }
0x10df   :  { %p1715_p2 = scmp.ne.s32.totalorder %s1287_s7, %s1714_s9  ;;  %p1720_p4 = scmp.lt.s32.totalorder %s1714_s9, %s1714_s9 }
0x10e0   :  { %1600 = vmatpush3.bf16.msra.mxu1 %v1599_v11 }
0x10e1   :  { %p1721_p5 = por %p1720_p4, %p1719_p3 }
0x10e3   :  { %p1722_p6 = pnand %p1721_p5, %p1715_p2 }
0x114b   :  { %v1071_v12 = vpop.permute.xlu0 %1070 }
0x114c   :  { %v1073_v13 = vmul.f32 %v1667_v62, %v1071_v12 }
0x114e   :  { %1075 = vrot.lane.b32.xlu1 %v1073_v13, %s1797_s30 }
0x114f   :  { %v623_v14 = vpop.permute.xlu0 %622 }
0x1150   :  { %625 = vst.msk [vmem:[#allocation12] sm:$0x3] %vm78_vm3, %v623_v14 }
0x1152   :  { %1081 = vrot.lane.b32.xlu1 %v1067_v4, %s1798_s6 }
0x11c0   :  { %v1076_v15 = vpop.permute.xlu1 %1075 }
0x11c1   :  { %1078 = vst.msk [vmem:[#allocation2 + $0x4] sm:$0x3] %vm78_vm3, %v1076_v15  ;;  %1079 = vst.msk [vmem:[#allocation10 + $0x2] sm:$0x3] %vm78_vm3, %v1076_v15 }
0x11c4   :  { %v1082_v19 = vpop.permute.xlu1 %1081 }
0x11c5   :  { %1084 = vst.msk [vmem:[#allocation12 + $0x2] sm:$0x3] %vm78_vm3, %v1082_v19 }
0x11c8   :  { %v1349_v21 = vld.sshfl [vmem:[#allocation2 + $0x4] sm:$0x3 pattern:$0x76325410] }
0x11c9   :  { %v1117_v22 = vcombine.low %v1109_v20, %v1349_v21 }
0x11cb   :  { %1528 = vmatmul.mubr.msk.f32.vlgmr.msra.gmra.mrb[10].mxu1 %vm202_vm4, %v1117_v22 }
0x11cc   :  { %1725 = shalt.err (!%p1722_p6)
}
0x11cd   :  { %s1726_s26 = scalar_lea.hbm %s2162_s13, 64 }
0x11ce   :  { %p1727_p7 = scmp.ne.s32.totalorder %s2162_s13, %s1726_s26  ;;  %p1730_p8 = scmp.lt.u32.totalorder %s1726_s26, %s2162_s13 }
0x11d0   :  { %p1732_p9 = pnand %p1730_p8, %p1727_p7 }
0x11d2   :  { %1735 = shalt.err (!%p1732_p9)
}
0x11d3   :  { %s1800_s28 = smov 2   ;;  %s1801_s6 = smov [#allocation12]  }
0x11d4   :  { %1292 = dma.vmem_to_hbm [thread:$0]  %s1287_s7, 64, %s2162_s13, [#allocation11], %s1797_s30, %s1797_s30, %s1800_s28  }
0x11d5   :  { %s1298_s29 = sshll.u32 %s1801_s6, 4  ;;  %s1299_s29 = int_to_ptr.vmem [resolvable:$true] %s1298_s29 }
0x11d6   :  { %s1736_s15 = scalar_lea.vmem %s1299_s29, 64  ;;  %p1741_p11 = scmp.lt.s32.totalorder %s1299_s29, %s1299_s29 }
0x11d7   :  { %p1737_p10 = scmp.ne.s32.totalorder %s1299_s29, %s1736_s15  ;;  %p1742_p12 = scmp.lt.s32.totalorder %s1736_s15, %s1736_s15 }
0x11d9   :  { %p1743_p13 = por %p1742_p12, %p1741_p11 }
0x11db   :  { %p1744_p0 = pnand %p1743_p13, %p1737_p10 }
0x11dd   :  { %1747 = shalt.err (!%p1744_p0)
}
0x11de   :  { %s1748_s19 = scalar_lea.hbm %s2163_s14, 64 }
0x11df   :  { %p1749_p1 = scmp.ne.s32.totalorder %s2163_s14, %s1748_s19  ;;  %p1752_p2 = scmp.lt.u32.totalorder %s1748_s19, %s2163_s14 }
0x11e1   :  { %p1754_p3 = pnand %p1752_p2, %p1749_p1 }
0x11e3   :  { %1757 = shalt.err (!%p1754_p3)
}
0x11e4   :  { %1304 = dma.vmem_to_hbm [thread:$0]  %s1299_s29, 64, %s2163_s14, [#allocation11], %s1797_s30, %s1797_s30, %s1800_s28  }
0x11e5   :  { %v1348_v46 = vld [vmem:[%s2157_s8] ss:$0 sm:$0xff]  ;;  %s1802_s1 = smov [#allocation9]  }
0x11e6   :  { %s1277_s7 = sshll.u32 %s1802_s1, 4  ;;  %s1278_s7 = int_to_ptr.vmem [resolvable:$true] %s1277_s7 }
0x11e7   :  { %s1758_s9 = scalar_lea.vmem %s1278_s7, 128  ;;  %p1763_p5 = scmp.lt.s32.totalorder %s1278_s7, %s1278_s7 }
0x11e8   :  { %p1759_p4 = scmp.ne.s32.totalorder %s1278_s7, %s1758_s9  ;;  %p1764_p6 = scmp.lt.s32.totalorder %s1758_s9, %s1758_s9 }
0x11ea   :  { %p1765_p7 = por %p1764_p6, %p1763_p5 }
0x11ec   :  { %p1766_p8 = pnand %p1765_p7, %p1759_p4 }
0x129e   :  { %v1186_v25 = vpop.f32.mrb[10].mxu1 }
0x129f   :  { %v1187_v26 = vadd.f32 %v1348_v46, %v1186_v25  ;;  %v1529_v27 = vpop.f32.mrb[11].mxu1 }
0x12a1   :  { %v1269_v28 = vadd.f32 %v1265_v23, %v1187_v26 }
0x12a3   :  { %1270 = vst [vmem:[#allocation9] sm:$0x3f] %v1269_v28 }
0x12a4   :  { %1769 = shalt.err (!%p1766_p8)
}
0x12a5   :  { %s1770_s5 = scalar_lea.hbm %s2161_s12, 128 }
0x12a6   :  { %p1771_p9 = scmp.ne.s32.totalorder %s2161_s12, %s1770_s5  ;;  %p1774_p10 = scmp.lt.u32.totalorder %s1770_s5, %s2161_s12 }
0x12a8   :  { %p1776_p11 = pnand %p1774_p10, %p1771_p9 }
0x12aa   :  { %1779 = shalt.err (!%p1776_p11)
}
0x12ab   :  { %1280 = dma.vmem_to_hbm [thread:$0]  %s1278_s7, 128, %s2161_s12, [#allocation6]  }
0x12ac   :  { %1784 = dma.done.wait [#allocation6], 128  }
0x12ad   :  { %1785 = vsyncadd [#allocation6], 4294967168 }
0x12ae   :  { %1786 = dma.done.wait [#allocation11], 128  }
0x12af   :  { %1787 = vsyncadd [#allocation11], 4294967168 }
0x12b0   :  { %1314 = vsyncpa [#allocation5], 1 }
0x12b1   :  { %1315 = vsyncpa [#allocation8], 1 }
0x12b2   :  { %1316 = vsyncpa [#allocation6], 1 }
0x12b3   :  { %1317 = vsyncpa [#allocation11], 1 }

</bundles_post_ra>
